<compile_context>
chip_gen: v7x
topology: tpu7x:2x2x1
jax: 0.10.0
libtpu: 0.0.40
codegen_flags: <defaults>
</compile_context>

<pallas_src>
import functools

import jax
import jax.numpy as jnp
from jax.experimental import pallas as pl
from jax.experimental.pallas import tpu as pltpu

LN_EPS = 1e-5                # PyTorch nn.LayerNorm default (biased variance)
QUERIES_PER_BLOCK = 16       # 16*1176 = 18816 reduction rows per grid step (multiple of 128)
RESIDENT_MAX_Q = 16          # up to this many queries: whole problem resident, one fused step
VMEM_LIMIT_BYTES = 32 * 1024 * 1024


def _fused_resident_kernel(num_classes, x_ref, w1_ref, p_ref, w2_ref, o_ref):
    """Whole forward fused in a single grid step (small num_queries)."""
    # (1, D) @ (D, 64) on the MXU, f32 accumulate.
    h = jnp.dot(x_ref[...], w1_ref[...], preferred_element_type=jnp.float32)
    h = h + p_ref[0:1, :]                                    # + b1
    mean = jnp.mean(h, axis=-1, keepdims=True)               # LayerNorm (biased variance)
    ctr = h - mean
    var = jnp.mean(ctr * ctr, axis=-1, keepdims=True)
    hn = ctr * jax.lax.rsqrt(var + LN_EPS)
    hn = hn * p_ref[1:2, :] + p_ref[2:3, :]                  # * gamma + beta
    hn = jnp.maximum(hn, 0.0)                                # ReLU
    out = jnp.dot(hn, w2_ref[...], preferred_element_type=jnp.float32)
    o_ref[...] = out + p_ref[3:4, 0:num_classes]             # + b2


def _partial_matvec_kernel(x_ref, w1_ref, o_ref):
    """One QB-query slice of h = x_flat @ W1 on the MXU (streamed large-Q path)."""
    o_ref[...] = jnp.dot(x_ref[...], w1_ref[...], preferred_element_type=jnp.float32)


def meta_network_pallas(queries, w_net, w1, b1, gamma, beta, w2, b2):
    """Forward: net-projection -> Linear -> LayerNorm -> ReLU -> Linear."""
    Q, S, E = queries.shape            # (num_queries, 28, 128)
    E2, Dd = w_net.shape               # (128, 42)
    D, H = w1.shape                    # (28*42*num_queries, 64)
    H2, C = w2.shape                   # (64, num_classes)
    assert E == E2 and H == H2 and D == Q * S * Dd
    assert C <= H, "num_classes must be <= hidden_size for the packed-bias layout"
    per_q = S * Dd                     # 1176 flattened features per query

    hp = jax.lax.Precision.HIGHEST
    # Black-box `net(embeded=query)` stand-in (external module): tiny XLA projection,
    # then the row-major flatten the module applies with out.view(1, -1).
    x_flat = jnp.einsum("qse,ed->qsd", queries, w_net, precision=hp).reshape(1, D)

    if Q <= RESIDENT_MAX_Q:
        # ---- Small-Q fast path: everything resident in VMEM, single fused kernel. ----
        b2_pad = jnp.zeros((1, H), jnp.float32).at[:, :C].set(b2)
        packed = jnp.concatenate([b1, gamma, beta, b2_pad], axis=0)   # (4, H): one DMA
        kernel = functools.partial(_fused_resident_kernel, C)
        return pl.pallas_call(
            kernel,
            out_shape=jax.ShapeDtypeStruct((1, C), jnp.float32),
            grid=(1,),
            in_specs=[
                pl.BlockSpec((1, D), lambda i: (0, 0)),      # flattened projected queries
                pl.BlockSpec((D, H), lambda i: (0, 0)),      # W1 (whole, resident)
                pl.BlockSpec((4, H), lambda i: (0, 0)),      # b1 / gamma / beta / b2 packed
                pl.BlockSpec((H, C), lambda i: (0, 0)),      # W2
            ],
            out_specs=pl.BlockSpec((1, C), lambda i: (0, 0)),
            compiler_params=pltpu.CompilerParams(
                dimension_semantics=("arbitrary",),
                vmem_limit_bytes=VMEM_LIMIT_BYTES,
            ),
        )(x_flat, w1, packed, w2)

    # ---- Large-Q path: stream W1 in QB-query tiles, one MXU partial matvec per step. ----
    qb = QUERIES_PER_BLOCK
    q_pad = pl.cdiv(Q, qb) * qb
    d_pad = q_pad * per_q
    d_blk = qb * per_q                 # 18816: multiple of 128 (lanes) and 8 (sublanes)
    if q_pad != Q:
        # TODO(synk): this zero-pad copies W1 once per call; for non-multiple-of-16 Q at
        # scale, pre-pad the weights outside the forward instead.
        x_flat = jnp.pad(x_flat, ((0, 0), (0, d_pad - D)))
        w1 = jnp.pad(w1, ((0, d_pad - D), (0, 0)))
    nb = d_pad // d_blk

    partials = pl.pallas_call(
        _partial_matvec_kernel,
        out_shape=jax.ShapeDtypeStruct((nb, 1, H), jnp.float32),
        grid=(nb,),
        in_specs=[
            pl.BlockSpec((1, d_blk), lambda i: (0, i)),      # x_flat chunk
            pl.BlockSpec((d_blk, H), lambda i: (i, 0)),      # W1 chunk (pipelined HBM stream)
        ],
        out_specs=pl.BlockSpec((None, 1, H), lambda i: (i, 0, 0)),
        compiler_params=pltpu.CompilerParams(
            dimension_semantics=("parallel",),   # independent partials -> both v7x TCs
            vmem_limit_bytes=VMEM_LIMIT_BYTES,
        ),
    )(x_flat, w1)

    # Tiny epilogue on a (1, 64) vector: bias + LayerNorm + ReLU + final Linear (plain XLA).
    h = jnp.sum(partials, axis=0) + b1
    mean = jnp.mean(h, axis=-1, keepdims=True)
    var = jnp.mean((h - mean) ** 2, axis=-1, keepdims=True)
    hn = (h - mean) * jax.lax.rsqrt(var + LN_EPS) * gamma + beta
    hn = jnp.maximum(hn, 0.0)
    return jnp.dot(hn, w2, precision=hp) + b2


def build_params(key, num_queries, num_classes=1, hidden_size=64):
    D = 28 * 42 * num_queries
    ks = jax.random.split(key, 8)
    # nn.Parameter(torch.rand(...)) -> uniform [0, 1)
    queries = jax.random.uniform(ks[0], (num_queries, 28, 128), jnp.float32)
    w1 = jax.random.uniform(ks[1], (D, hidden_size), jnp.float32, minval=-0.02, maxval=0.02)
    b1 = jax.random.uniform(ks[2], (1, hidden_size), jnp.float32, minval=-0.02, maxval=0.02)
    gamma = jnp.ones((1, hidden_size), jnp.float32)     # LayerNorm weight init
    beta = jnp.zeros((1, hidden_size), jnp.float32)     # LayerNorm bias init
    w2 = jax.random.uniform(ks[3], (hidden_size, num_classes), jnp.float32,
                            minval=-0.1, maxval=0.1)
    b2 = jax.random.uniform(ks[4], (1, num_classes), jnp.float32, minval=-0.1, maxval=0.1)
    # TODO(synk): `net(embeded=query)` is an arbitrary external nn.Module; simulated by this
    # deterministic 128->42 linear projection so 28*42*num_queries matches the Linear.
    w_net = jax.random.uniform(ks[5], (128, 42), jnp.float32, minval=-0.05, maxval=0.05)
    return queries, w_net, w1, b1, gamma, beta, w2, b2


def reference_forward(queries, w_net, w1, b1, gamma, beta, w2, b2):
    """Pure-JAX reference (highest-precision matmuls) for correctness checking."""
    hp = jax.lax.Precision.HIGHEST
    out = jnp.einsum("qse,ed->qsd", queries, w_net, precision=hp)   # net(embeded=query)
    x = out.reshape(1, -1)
    h = jnp.dot(x, w1, precision=hp) + b1
    mean = jnp.mean(h, axis=-1, keepdims=True)
    var = jnp.mean((h - mean) ** 2, axis=-1, keepdims=True)
    h = (h - mean) / jnp.sqrt(var + LN_EPS) * gamma + beta
    h = jnp.maximum(h, 0.0)
    return jnp.dot(h, w2, precision=hp) + b2


if __name__ == "__main__":
    num_classes = 1
    # 4 queries -> resident fused path; 32 queries -> streamed, "parallel"-axis path.
    for num_queries in (4, 32):
        params = build_params(jax.random.PRNGKey(0), num_queries, num_classes)
        y = jax.block_until_ready(jax.jit(meta_network_pallas)(*params))
        y_ref = reference_forward(*params)
        assert y.shape == (1, num_classes)
        # Tolerance covers MXU f32 pass rounding + partial-sum reassociation over the
        # 28*42*num_queries-long reduction (weights intentionally kept f32, not bf16).
        assert jnp.allclose(y, y_ref, atol=2e-3, rtol=2e-3), (num_queries, y, y_ref)
    print("KERNEL_OK")
</pallas_src>

<mosaic_0001>
module attributes {stable_mosaic.version = 11 : i64} {
  func.func @_fused_resident_kernel(%arg0: i32, %arg1: memref<1x4704xf32, #tpu.memory_space<vmem>>, %arg2: memref<4704x64xf32, #tpu.memory_space<vmem>>, %arg3: memref<4x64xf32, #tpu.memory_space<vmem>>, %arg4: memref<64x1xf32, #tpu.memory_space<vmem>>, %arg5: memref<1x1xf32, #tpu.memory_space<vmem>>) attributes {dimension_semantics = [#tpu.dimension_semantics<arbitrary>], iteration_bounds = array<i64: 1>, scalar_prefetch = 0 : i64, scratch_operands = 0 : i64, tpu.core_type = #tpu.core_type<tc>, window_params = [{pipeline_mode = #tpu.pipeline_mode<synchronous>, transform_indices = @transform_0, window_bounds = array<i64: 1, 4704>}, {pipeline_mode = #tpu.pipeline_mode<synchronous>, transform_indices = @transform_1, window_bounds = array<i64: 4704, 64>}, {pipeline_mode = #tpu.pipeline_mode<synchronous>, transform_indices = @transform_2, window_bounds = array<i64: 4, 64>}, {pipeline_mode = #tpu.pipeline_mode<synchronous>, transform_indices = @transform_3, window_bounds = array<i64: 64, 1>}, {pipeline_mode = #tpu.pipeline_mode<synchronous>, transform_indices = @transform_4, window_bounds = array<i64: 1, 1>}]} {
    %c0 = arith.constant 0 : index
    %c0_0 = arith.constant 0 : index
    %0 = vector.load %arg1[%c0, %c0_0] : memref<1x4704xf32, #tpu.memory_space<vmem>>, vector<1x4704xf32>
    %c0_1 = arith.constant 0 : index
    %c0_2 = arith.constant 0 : index
    %1 = vector.load %arg2[%c0_1, %c0_2] : memref<4704x64xf32, #tpu.memory_space<vmem>>, vector<4704x64xf32>
    %cst = arith.constant dense<0.000000e+00> : vector<1x64xf32>
    %2 = tpu.matmul %0, %1, %cst {dimension_numbers = #tpu.dot_dimension_numbers<[1], [0], [0], [1], [0, 0, 1, 1], [], []>} : vector<1x4704xf32>, vector<4704x64xf32>, vector<1x64xf32> -> vector<1x64xf32>
    %c0_3 = arith.constant 0 : index
    %c0_4 = arith.constant 0 : index
    %3 = vector.load %arg3[%c0_3, %c0_4] : memref<4x64xf32, #tpu.memory_space<vmem>>, vector<1x64xf32>
    %4 = arith.addf %2, %3 : vector<1x64xf32>
    %cst_5 = arith.constant dense<0.000000e+00> : vector<1xf32>
    %5 = vector.multi_reduction <add>, %4, %cst_5 [1] : vector<1x64xf32> to vector<1xf32>
    %6 = vector.shape_cast %5 : vector<1xf32> to vector<1x1xf32>
    %cst_6 = arith.constant 6.400000e+01 : f32
    %7 = vector.broadcast %cst_6 : f32 to vector<1x1xf32>
    %8 = arith.divf %6, %7 : vector<1x1xf32>
    %9 = vector.broadcast %8 : vector<1x1xf32> to vector<1x64xf32>
    %10 = arith.subf %4, %9 : vector<1x64xf32>
    %11 = arith.mulf %10, %10 : vector<1x64xf32>
    %cst_7 = arith.constant dense<0.000000e+00> : vector<1xf32>
    %12 = vector.multi_reduction <add>, %11, %cst_7 [1] : vector<1x64xf32> to vector<1xf32>
    %13 = vector.shape_cast %12 : vector<1xf32> to vector<1x1xf32>
    %cst_8 = arith.constant 6.400000e+01 : f32
    %14 = vector.broadcast %cst_8 : f32 to vector<1x1xf32>
    %15 = arith.divf %13, %14 : vector<1x1xf32>
    %cst_9 = arith.constant 9.99999974E-6 : f32
    %16 = vector.broadcast %cst_9 : f32 to vector<1x1xf32>
    %17 = arith.addf %15, %16 : vector<1x1xf32>
    %18 = math.rsqrt %17 : vector<1x1xf32>
    %19 = vector.broadcast %18 : vector<1x1xf32> to vector<1x64xf32>
    %20 = arith.mulf %10, %19 : vector<1x64xf32>
    %c1 = arith.constant 1 : index
    %c0_10 = arith.constant 0 : index
    %21 = vector.load %arg3[%c1, %c0_10] : memref<4x64xf32, #tpu.memory_space<vmem>>, vector<1x64xf32>
    %22 = arith.mulf %20, %21 : vector<1x64xf32>
    %c2 = arith.constant 2 : index
    %c0_11 = arith.constant 0 : index
    %23 = vector.load %arg3[%c2, %c0_11] : memref<4x64xf32, #tpu.memory_space<vmem>>, vector<1x64xf32>
    %24 = arith.addf %22, %23 : vector<1x64xf32>
    %cst_12 = arith.constant 0.000000e+00 : f32
    %25 = vector.broadcast %cst_12 : f32 to vector<1x64xf32>
    %26 = arith.maximumf %24, %25 : vector<1x64xf32>
    %c0_13 = arith.constant 0 : index
    %c0_14 = arith.constant 0 : index
    %27 = vector.load %arg4[%c0_13, %c0_14] : memref<64x1xf32, #tpu.memory_space<vmem>>, vector<64x1xf32>
    %cst_15 = arith.constant dense<0.000000e+00> : vector<1x1xf32>
    %28 = tpu.matmul %26, %27, %cst_15 {dimension_numbers = #tpu.dot_dimension_numbers<[1], [0], [0], [1], [0, 0, 1, 1], [], []>} : vector<1x64xf32>, vector<64x1xf32>, vector<1x1xf32> -> vector<1x1xf32>
    %c3 = arith.constant 3 : index
    %c0_16 = arith.constant 0 : index
    %29 = vector.load %arg3[%c3, %c0_16] : memref<4x64xf32, #tpu.memory_space<vmem>>, vector<1x1xf32>
    %30 = arith.addf %28, %29 : vector<1x1xf32>
    %c0_17 = arith.constant 0 : index
    %c0_18 = arith.constant 0 : index
    %31 = vector.load %arg5[%c0_17, %c0_18] : memref<1x1xf32, #tpu.memory_space<vmem>>, vector<1x1xf32>
    tpu.vector_store %arg5[%c0_17, %c0_18], %30 {strides = array<i32>} : memref<1x1xf32, #tpu.memory_space<vmem>>, vector<1x1xf32>,
    return
  }
  func.func @transform_0(%arg0: i32) -> (i32, i32) {
    %c0_i32 = arith.constant 0 : i32
    %c0_i32_0 = arith.constant 0 : i32
    %c0_i32_1 = arith.constant 0 : i32
    return %c0_i32, %c0_i32_0 : i32, i32
  }
  func.func @transform_1(%arg0: i32) -> (i32, i32) {
    %c0_i32 = arith.constant 0 : i32
    %c0_i32_0 = arith.constant 0 : i32
    %c0_i32_1 = arith.constant 0 : i32
    return %c0_i32, %c0_i32_0 : i32, i32
  }
  func.func @transform_2(%arg0: i32) -> (i32, i32) {
    %c0_i32 = arith.constant 0 : i32
    %c0_i32_0 = arith.constant 0 : i32
    %c0_i32_1 = arith.constant 0 : i32
    return %c0_i32, %c0_i32_0 : i32, i32
  }
  func.func @transform_3(%arg0: i32) -> (i32, i32) {
    %c0_i32 = arith.constant 0 : i32
    %c0_i32_0 = arith.constant 0 : i32
    %c0_i32_1 = arith.constant 0 : i32
    return %c0_i32, %c0_i32_0 : i32, i32
  }
  func.func @transform_4(%arg0: i32) -> (i32, i32) {
    %c0_i32 = arith.constant 0 : i32
    %c0_i32_0 = arith.constant 0 : i32
    %c0_i32_1 = arith.constant 0 : i32
    return %c0_i32, %c0_i32_0 : i32, i32
  }
}

</mosaic_0001>

<bundles_post_ra>
// kernel: meta_network_pallas.1
= control target key start
LH: loop header
LB: loop body
LE: loop exit
PB: predicated region body
PF: predicated region fallthrough
CT: control target
= control target key end

     0   :  { %v617_v43 = vlaneseq  ;;  %s5568_s0 = inlined_call_operand.vmem [shape: f32[1,4704], index: 0, kind: input, shape index: {}]   ;;  %s5569_s1 = inlined_call_operand.vmem [shape: f32[4704,64], index: 1, kind: input, shape index: {}]   ;;  %s5570_s2 = inlined_call_operand.vmem [shape: f32[4,64], index: 2, kind: input, shape index: {}]   ;;  %s5571_s3 = inlined_call_operand.vmem [shape: f32[64,1], index: 3, kind: input, shape index: {}]   ;;  %s5572_s4 = inlined_call_operand.hbm [shape: f32[1,1], index: 4, kind: output, shape index: {}]  }
   0x1   :  { %v39_v0 = vld [vmem:[%s5569_s1 + $0x80] sm:$0xff]  ;;  %v40_v1 = vld [vmem:[%s5569_s1 + $0x88] sm:$0xff]  ;;  %v41_v11 = vld [vmem:[%s5569_s1 + $0x90] sm:$0xff] }
   0x2   :  { %v23_v2 = vld [vmem:[%s5569_s1] sm:$0xff]  ;;  %v2953_v3 = vpack.c.bf16 %v40_v1, %v39_v0  ;;  %v24_v4 = vld [vmem:[%s5569_s1 + $0x8] sm:$0xff]  ;;  %v42_v13 = vld [vmem:[%s5569_s1 + $0x98] sm:$0xff]  ;;  %v3735_v57 = vshrl.u32 %v617_v43, 7 }
   0x3   :  { %v71_v5 = vld [vmem:[%s5569_s1 + $0x180] sm:$0xff]  ;;  %v72_v6 = vld [vmem:[%s5569_s1 + $0x188] sm:$0xff]  ;;  %v2955_v7 = vpack.c.bf16 %v24_v4, %v23_v2  ;;  %v25_v14 = vld [vmem:[%s5569_s1 + $0x10] sm:$0xff]  ;;  %v2957_v16 = vpack.c.bf16 %v42_v13, %v41_v11 }
   0x4   :  { %v2985_v8 = vpack.c.bf16 %v72_v6, %v71_v5  ;;  %v55_v9 = vld [vmem:[%s5569_s1 + $0x100] sm:$0xff]  ;;  %v56_v10 = vld [vmem:[%s5569_s1 + $0x108] sm:$0xff]  ;;  %2954 = vmatprep.subr.bf16.mxu0 %v2953_v3  ;;  %v26_v15 = vld [vmem:[%s5569_s1 + $0x18] sm:$0xff]  ;;  %v3762_v6 = vsub.s32 1, %v3735_v57  ;;  %v3774_v11 = vsub.s32 3, %v3735_v57  ;;  %v3843_v43 = vsub.s32 2, %v3735_v57 }
   0x5   :  { %v2987_v12 = vpack.c.bf16 %v56_v10, %v55_v9  ;;  %2956 = vmatpush3.bf16.msra.mxu0 %v2955_v7  ;;  %v2959_v17 = vpack.c.bf16 %v26_v15, %v25_v14  ;;  %v73_v18 = vld [vmem:[%s5569_s1 + $0x190] sm:$0xff]  ;;  %v74_v19 = vld [vmem:[%s5569_s1 + $0x198] sm:$0xff]  ;;  %v43_v23 = vld [vmem:[%s5569_s1 + $0xa0] sm:$0xff] }
   0x6   :  { %2986 = vmatprep.subr.bf16.mxu1 %v2985_v8  ;;  %v57_v20 = vld [vmem:[%s5569_s1 + $0x110] sm:$0xff]  ;;  %v2989_v21 = vpack.c.bf16 %v74_v19, %v73_v18  ;;  %v58_v22 = vld [vmem:[%s5569_s1 + $0x118] sm:$0xff]  ;;  %v44_v24 = vld [vmem:[%s5569_s1 + $0xa8] sm:$0xff]  ;;  %2958 = vmatprep.subr.bf16.mxu0 %v2957_v16 }
   0x7   :  { %2988 = vmatpush3.bf16.msra.mxu1 %v2987_v12  ;;  %v2991_v25 = vpack.c.bf16 %v58_v22, %v57_v20  ;;  %v2961_v26 = vpack.c.bf16 %v44_v24, %v43_v23  ;;  %v27_v27 = vld [vmem:[%s5569_s1 + $0x20] sm:$0xff]  ;;  %v28_v28 = vld [vmem:[%s5569_s1 + $0x28] sm:$0xff]  ;;  %v45_v35 = vld [vmem:[%s5569_s1 + $0xb0] sm:$0xff] }
   0x8   :  { %v75_v29 = vld [vmem:[%s5569_s1 + $0x1a0] sm:$0xff]  ;;  %2990 = vmatprep.subr.bf16.mxu1 %v2989_v21  ;;  %v76_v30 = vld [vmem:[%s5569_s1 + $0x1a8] sm:$0xff]  ;;  %v2963_v33 = vpack.c.bf16 %v28_v28, %v27_v27  ;;  %v46_v36 = vld [vmem:[%s5569_s1 + $0xb8] sm:$0xff] }
   0x9   :  { %v59_v31 = vld [vmem:[%s5569_s1 + $0x120] sm:$0xff]  ;;  %v60_v32 = vld [vmem:[%s5569_s1 + $0x128] sm:$0xff]  ;;  %2960 = vmatpush3.bf16.msra.mxu0 %v2959_v17  ;;  %v2993_v34 = vpack.c.bf16 %v76_v30, %v75_v29  ;;  %v29_v37 = vld [vmem:[%s5569_s1 + $0x30] sm:$0xff]  ;;  %v2965_v39 = vpack.c.bf16 %v46_v36, %v45_v35 }
   0xa   :  { %2962 = vmatprep.subr.bf16.mxu0 %v2961_v26  ;;  %v2995_v38 = vpack.c.bf16 %v60_v32, %v59_v31  ;;  %v30_v40 = vld [vmem:[%s5569_s1 + $0x38] sm:$0xff]  ;;  %v77_v41 = vld [vmem:[%s5569_s1 + $0x1b0] sm:$0xff]  ;;  %v47_v47 = vld [vmem:[%s5569_s1 + $0xc0] sm:$0xff] }
   0xb   :  { %2992 = vmatpush3.bf16.msra.mxu1 %v2991_v25  ;;  %v78_v42 = vld [vmem:[%s5569_s1 + $0x1b8] sm:$0xff]  ;;  %v61_v45 = vld [vmem:[%s5569_s1 + $0x130] sm:$0xff]  ;;  %v48_v48 = vld [vmem:[%s5569_s1 + $0xc8] sm:$0xff]  ;;  %v2967_v49 = vpack.c.bf16 %v30_v40, %v29_v37 }
   0xc   :  { %2994 = vmatprep.subr.bf16.mxu1 %v2993_v34  ;;  %v2997_v44 = vpack.c.bf16 %v78_v42, %v77_v41  ;;  %v62_v46 = vld [vmem:[%s5569_s1 + $0x138] sm:$0xff]  ;;  %v79_v50 = vld [vmem:[%s5569_s1 + $0x1c0] sm:$0xff]  ;;  %v80_v51 = vld [vmem:[%s5569_s1 + $0x1c8] sm:$0xff]  ;;  %v2969_v53 = vpack.c.bf16 %v48_v48, %v47_v47 }
   0xd   :  { %2964 = vmatpush3.bf16.msra.mxu0 %v2963_v33  ;;  %v2999_v52 = vpack.c.bf16 %v62_v46, %v61_v45  ;;  %v31_v54 = vld [vmem:[%s5569_s1 + $0x40] sm:$0xff]  ;;  %v32_v55 = vld [vmem:[%s5569_s1 + $0x48] sm:$0xff]  ;;  %v3001_v58 = vpack.c.bf16 %v80_v51, %v79_v50  ;;  %v49_v60 = vld [vmem:[%s5569_s1 + $0xd0] sm:$0xff] }
   0xe   :  { %2966 = vmatprep.subr.bf16.mxu0 %v2965_v39  ;;  %v63_v56 = vld [vmem:[%s5569_s1 + $0x140] sm:$0xff]  ;;  %v64_v59 = vld [vmem:[%s5569_s1 + $0x148] sm:$0xff]  ;;  %v50_v61 = vld [vmem:[%s5569_s1 + $0xd8] sm:$0xff]  ;;  %v2971_v0 = vpack.c.bf16 %v32_v55, %v31_v54  ;;  %v3834_v39 = vsub.s32 0, %v3735_v57 }
   0xf   :  { %2996 = vmatpush3.bf16.msra.mxu1 %v2995_v38  ;;  %v81_v62 = vld [vmem:[%s5569_s1 + $0x1d0] sm:$0xff]  ;;  %v82_v63 = vld [vmem:[%s5569_s1 + $0x1d8] sm:$0xff]  ;;  %v3003_v1 = vpack.c.bf16 %v64_v59, %v63_v56  ;;  %v2973_v2 = vpack.c.bf16 %v50_v61, %v49_v60  ;;  %v51_v9 = vld [vmem:[%s5569_s1 + $0xe0] sm:$0xff] }
  0x10   :  { %2998 = vmatprep.subr.bf16.mxu1 %v2997_v44  ;;  %v33_v3 = vld [vmem:[%s5569_s1 + $0x50] sm:$0xff]  ;;  %v34_v4 = vld [vmem:[%s5569_s1 + $0x58] sm:$0xff]  ;;  %v3005_v7 = vpack.c.bf16 %v82_v63, %v81_v62  ;;  %v52_v10 = vld [vmem:[%s5569_s1 + $0xe8] sm:$0xff] }
  0x11   :  { %2968 = vmatpush3.bf16.msra.mxu0 %v2967_v49  ;;  %v65_v5 = vld [vmem:[%s5569_s1 + $0x150] sm:$0xff]  ;;  %v66_v8 = vld [vmem:[%s5569_s1 + $0x158] sm:$0xff]  ;;  %v83_v12 = vld [vmem:[%s5569_s1 + $0x1e0] sm:$0xff]  ;;  %v2975_v14 = vpack.c.bf16 %v34_v4, %v33_v3  ;;  %v2977_v17 = vpack.c.bf16 %v52_v10, %v51_v9 }
  0x12   :  { %2970 = vmatprep.subr.bf16.mxu0 %v2969_v53  ;;  %v84_v13 = vld [vmem:[%s5569_s1 + $0x1e8] sm:$0xff]  ;;  %v3785_v15 = vld [vmem:[%s5568_s0] sm:$0xff]  ;;  %v3007_v16 = vpack.c.bf16 %v66_v8, %v65_v5  ;;  %v53_v24 = vld [vmem:[%s5569_s1 + $0xf0] sm:$0xff]  ;;  %v3864_v53 = vsub.s32 5, %v3735_v57 }
  0x13   :  { %3000 = vmatpush3.bf16.msra.mxu1 %v2999_v52  ;;  %v35_v18 = vld [vmem:[%s5569_s1 + $0x60] sm:$0xff]  ;;  %v36_v19 = vld [vmem:[%s5569_s1 + $0x68] sm:$0xff]  ;;  %v624_v21 = vrot.slane %v3785_v15, %v3762_v6  ;;  %v3009_v22 = vpack.c.bf16 %v84_v13, %v83_v12  ;;  %v54_v25 = vld [vmem:[%s5569_s1 + $0xf8] sm:$0xff]  ;;  %v632_v26 = vrot.slane %v3785_v15, %v3774_v11  ;;  %v620_v54 = vrot.slane %v3785_v15, %v3834_v39 }
  0x14   :  { %3002 = vmatprep.subr.bf16.mxu1 %v3001_v58  ;;  %v67_v20 = vld [vmem:[%s5569_s1 + $0x160] sm:$0xff]  ;;  %v68_v23 = vld [vmem:[%s5569_s1 + $0x168] sm:$0xff]  ;;  %v85_v27 = vld [vmem:[%s5569_s1 + $0x1f0] sm:$0xff]  ;;  %v2979_v29 = vpack.c.bf16 %v36_v19, %v35_v18  ;;  %v2981_v31 = vpack.c.bf16 %v54_v25, %v53_v24  ;;  %v3875_v58 = vsub.s32 7, %v3735_v57  ;;  %v628_v60 = vrot.slane %v3785_v15, %v3843_v43 }
  0x15   :  { %2972 = vmatpush3.bf16.msra.mxu0 %v2971_v0  ;;  %v86_v28 = vld [vmem:[%s5569_s1 + $0x1f8] sm:$0xff]  ;;  %868 = vmatprep.mubr.f32.mxu0 %v624_v21  ;;  %v3011_v30 = vpack.c.bf16 %v68_v23, %v67_v20  ;;  %v37_v32 = vld [vmem:[%s5569_s1 + $0x70] sm:$0xff]  ;;  %v103_v37 = vld [vmem:[%s5569_s1 + $0x280] sm:$0xff] }
  0x16   :  { %2974 = vmatprep.subr.bf16.mxu0 %v2973_v2  ;;  %938 = vmatprep.mubr.f32.mxu1 %v632_v26  ;;  %v38_v33 = vld [vmem:[%s5569_s1 + $0x78] sm:$0xff]  ;;  %v69_v34 = vld [vmem:[%s5569_s1 + $0x170] sm:$0xff]  ;;  %v3013_v35 = vpack.c.bf16 %v86_v28, %v85_v27  ;;  %v104_v38 = vld [vmem:[%s5569_s1 + $0x288] sm:$0xff]  ;;  %v648_v10 = vrot.slane %v3785_v15, %v3875_v58 }
  0x17   :  { %3004 = vmatpush3.bf16.msra.mxu1 %v3003_v1  ;;  %v70_v36 = vld [vmem:[%s5569_s1 + $0x178] sm:$0xff]  ;;  %v135_v40 = vld [vmem:[%s5569_s1 + $0x380] sm:$0xff]  ;;  %v136_v41 = vld [vmem:[%s5569_s1 + $0x388] sm:$0xff]  ;;  %v2983_v42 = vpack.c.bf16 %v38_v33, %v37_v32  ;;  %v3017_v45 = vpack.c.bf16 %v104_v38, %v103_v37 }
  0x18   :  { %3006 = vmatprep.subr.bf16.mxu1 %v3005_v7  ;;  %v3015_v44 = vpack.c.bf16 %v70_v36, %v69_v34  ;;  %v87_v46 = vld [vmem:[%s5569_s1 + $0x200] sm:$0xff]  ;;  %v88_v47 = vld [vmem:[%s5569_s1 + $0x208] sm:$0xff]  ;;  %v3049_v49 = vpack.c.bf16 %v136_v41, %v135_v40  ;;  %v105_v51 = vld [vmem:[%s5569_s1 + $0x290] sm:$0xff]  ;;  %v640_v7 = vrot.slane %v3785_v15, %v3864_v53 }
  0x19   :  { %2976 = vmatpush3.bf16.msra.mxu0 %v2975_v14  ;;  %v119_v48 = vld [vmem:[%s5569_s1 + $0x300] sm:$0xff]  ;;  %v120_v50 = vld [vmem:[%s5569_s1 + $0x308] sm:$0xff]  ;;  %v106_v52 = vld [vmem:[%s5569_s1 + $0x298] sm:$0xff]  ;;  %v3019_v59 = vpack.c.bf16 %v88_v47, %v87_v46 }
  0x1a   :  { %2978 = vmatprep.subr.bf16.mxu0 %v2977_v17  ;;  %v137_v55 = vld [vmem:[%s5569_s1 + $0x390] sm:$0xff]  ;;  %v138_v56 = vld [vmem:[%s5569_s1 + $0x398] sm:$0xff]  ;;  %v3051_v61 = vpack.c.bf16 %v120_v50, %v119_v48  ;;  %v3021_v62 = vpack.c.bf16 %v106_v52, %v105_v51  ;;  %v107_v4 = vld [vmem:[%s5569_s1 + $0x2a0] sm:$0xff] }
  0x1b   :  { %3008 = vmatpush3.bf16.msra.mxu1 %v3007_v16  ;;  %v89_v63 = vld [vmem:[%s5569_s1 + $0x210] sm:$0xff]  ;;  %v90_v0 = vld [vmem:[%s5569_s1 + $0x218] sm:$0xff]  ;;  %v3053_v2 = vpack.c.bf16 %v138_v56, %v137_v55  ;;  %v108_v5 = vld [vmem:[%s5569_s1 + $0x2a8] sm:$0xff] }
  0x1c   :  { %3010 = vmatprep.subr.bf16.mxu1 %v3009_v22  ;;  %v121_v1 = vld [vmem:[%s5569_s1 + $0x310] sm:$0xff]  ;;  %v122_v3 = vld [vmem:[%s5569_s1 + $0x318] sm:$0xff]  ;;  %v139_v8 = vld [vmem:[%s5569_s1 + $0x3a0] sm:$0xff]  ;;  %v3023_v12 = vpack.c.bf16 %v90_v0, %v89_v63  ;;  %v3025_v14 = vpack.c.bf16 %v108_v5, %v107_v4 }
  0x1d   :  { %2980 = vmatpush3.bf16.msra.mxu0 %v2979_v29  ;;  %v140_v9 = vld [vmem:[%s5569_s1 + $0x3a8] sm:$0xff]  ;;  %v3055_v13 = vpack.c.bf16 %v122_v3, %v121_v1  ;;  %v91_v16 = vld [vmem:[%s5569_s1 + $0x220] sm:$0xff]  ;;  %v109_v21 = vld [vmem:[%s5569_s1 + $0x2b0] sm:$0xff] }
  0x1e   :  { %2982 = vmatprep.subr.bf16.mxu0 %v2981_v31  ;;  %v92_v17 = vld [vmem:[%s5569_s1 + $0x228] sm:$0xff]  ;;  %v123_v18 = vld [vmem:[%s5569_s1 + $0x320] sm:$0xff]  ;;  %v3057_v19 = vpack.c.bf16 %v140_v9, %v139_v8  ;;  %v110_v22 = vld [vmem:[%s5569_s1 + $0x2b8] sm:$0xff] }
  0x1f   :  { %3012 = vmatpush3.bf16.msra.mxu1 %v3011_v30  ;;  %v124_v20 = vld [vmem:[%s5569_s1 + $0x328] sm:$0xff]  ;;  %v141_v23 = vld [vmem:[%s5569_s1 + $0x3b0] sm:$0xff]  ;;  %v142_v24 = vld [vmem:[%s5569_s1 + $0x3b8] sm:$0xff]  ;;  %v3027_v25 = vpack.c.bf16 %v92_v17, %v91_v16  ;;  %v3029_v27 = vpack.c.bf16 %v110_v22, %v109_v21 }
  0x20   :  { %3014 = vmatprep.subr.bf16.mxu1 %v3013_v35  ;;  %v3059_v26 = vpack.c.bf16 %v124_v20, %v123_v18  ;;  %v93_v28 = vld [vmem:[%s5569_s1 + $0x230] sm:$0xff]  ;;  %v94_v29 = vld [vmem:[%s5569_s1 + $0x238] sm:$0xff]  ;;  %v3061_v31 = vpack.c.bf16 %v142_v24, %v141_v23  ;;  %v111_v33 = vld [vmem:[%s5569_s1 + $0x2c0] sm:$0xff] }
  0x21   :  { %2984 = vmatpush3.bf16.msra.mxu0 %v2983_v42  ;;  %v125_v30 = vld [vmem:[%s5569_s1 + $0x330] sm:$0xff]  ;;  %v126_v32 = vld [vmem:[%s5569_s1 + $0x338] sm:$0xff]  ;;  %v112_v34 = vld [vmem:[%s5569_s1 + $0x2c8] sm:$0xff]  ;;  %v3031_v37 = vpack.c.bf16 %v94_v29, %v93_v28 }
  0x22   :  { %3018 = vmatprep.subr.bf16.mxu0 %v3017_v45  ;;  %v143_v35 = vld [vmem:[%s5569_s1 + $0x3c0] sm:$0xff]  ;;  %v144_v36 = vld [vmem:[%s5569_s1 + $0x3c8] sm:$0xff]  ;;  %v3063_v38 = vpack.c.bf16 %v126_v32, %v125_v30  ;;  %v3033_v40 = vpack.c.bf16 %v112_v34, %v111_v33  ;;  %v113_v47 = vld [vmem:[%s5569_s1 + $0x2d0] sm:$0xff] }
  0x23   :  { %3016 = vmatpush3.bf16.msra.mxu1 %v3015_v44  ;;  %v95_v41 = vld [vmem:[%s5569_s1 + $0x240] sm:$0xff]  ;;  %v96_v42 = vld [vmem:[%s5569_s1 + $0x248] sm:$0xff]  ;;  %v3065_v45 = vpack.c.bf16 %v144_v36, %v143_v35  ;;  %v114_v48 = vld [vmem:[%s5569_s1 + $0x2d8] sm:$0xff] }
  0x24   :  { %3050 = vmatprep.subr.bf16.mxu1 %v3049_v49  ;;  %869 = vmatmul.mubr.f32.vlgmr.msra.gmra.mrb[0].mxu0 %v620_v54  ;;  %v127_v44 = vld [vmem:[%s5569_s1 + $0x340] sm:$0xff]  ;;  %v128_v46 = vld [vmem:[%s5569_s1 + $0x348] sm:$0xff]  ;;  %v145_v49 = vld [vmem:[%s5569_s1 + $0x3d0] sm:$0xff]  ;;  %v3035_v51 = vpack.c.bf16 %v96_v42, %v95_v41  ;;  %v3037_v54 = vpack.c.bf16 %v114_v48, %v113_v47 }
  0x25   :  { %3020 = vmatpush3.bf16.msra.mxu0 %v3019_v59  ;;  %1008 = vmatprep.mubr.f32.mxu0 %v640_v7  ;;  %v146_v50 = vld [vmem:[%s5569_s1 + $0x3d8] sm:$0xff]  ;;  %v3067_v52 = vpack.c.bf16 %v128_v46, %v127_v44  ;;  %v97_v55 = vld [vmem:[%s5569_s1 + $0x250] sm:$0xff]  ;;  %v116_v63 = vld [vmem:[%s5569_s1 + $0x2e8] sm:$0xff] }
  0x26   :  { %939 = vmatmul.mubr.f32.vlgmr.msra.gmra.mrb[0].mxu1 %v628_v60  ;;  %3022 = vmatprep.subr.bf16.mxu0 %v3021_v62  ;;  %v98_v56 = vld [vmem:[%s5569_s1 + $0x258] sm:$0xff]  ;;  %v129_v59 = vld [vmem:[%s5569_s1 + $0x350] sm:$0xff]  ;;  %v3069_v60 = vpack.c.bf16 %v146_v50, %v145_v49  ;;  %v115_v62 = vld [vmem:[%s5569_s1 + $0x2e0] sm:$0xff] }
  0x27   :  { %3052 = vmatpush3.bf16.msra.mxu1 %v3051_v61  ;;  %1078 = vmatprep.mubr.f32.mxu1 %v648_v10  ;;  %v130_v61 = vld [vmem:[%s5569_s1 + $0x358] sm:$0xff]  ;;  %v147_v0 = vld [vmem:[%s5569_s1 + $0x3e0] sm:$0xff]  ;;  %v148_v1 = vld [vmem:[%s5569_s1 + $0x3e8] sm:$0xff]  ;;  %v3041_v4 = vpack.c.bf16 %v116_v63, %v115_v62 }
  0x28   :  { %3054 = vmatprep.subr.bf16.mxu1 %v3053_v2  ;;  %v3039_v2 = vpack.c.bf16 %v98_v56, %v97_v55  ;;  %v3071_v3 = vpack.c.bf16 %v130_v61, %v129_v59  ;;  %v99_v5 = vld [vmem:[%s5569_s1 + $0x260] sm:$0xff]  ;;  %v100_v7 = vld [vmem:[%s5569_s1 + $0x268] sm:$0xff]  ;;  %v3073_v9 = vpack.c.bf16 %v148_v1, %v147_v0  ;;  %v150_v16 = vld [vmem:[%s5569_s1 + $0x3f8] sm:$0xff] }
  0x29   :  { %3024 = vmatpush3.bf16.msra.mxu0 %v3023_v12  ;;  %v131_v8 = vld [vmem:[%s5569_s1 + $0x360] sm:$0xff]  ;;  %v132_v10 = vld [vmem:[%s5569_s1 + $0x368] sm:$0xff]  ;;  %v117_v12 = vld [vmem:[%s5569_s1 + $0x2f0] sm:$0xff]  ;;  %v3043_v17 = vpack.c.bf16 %v100_v7, %v99_v5 }
  0x2a   :  { %3026 = vmatprep.subr.bf16.mxu0 %v3025_v14  ;;  %v149_v14 = vld [vmem:[%s5569_s1 + $0x3f0] sm:$0xff]  ;;  %v3075_v18 = vpack.c.bf16 %v132_v10, %v131_v8  ;;  %v102_v21 = vld [vmem:[%s5569_s1 + $0x278] sm:$0xff]  ;;  %v199_v28 = vld [vmem:[%s5569_s1 + $0x580] sm:$0xff] }
  0x2b   :  { %3056 = vmatpush3.bf16.msra.mxu1 %v3055_v13  ;;  %v118_v13 = vld [vmem:[%s5569_s1 + $0x2f8] sm:$0xff]  ;;  %v101_v20 = vld [vmem:[%s5569_s1 + $0x270] sm:$0xff]  ;;  %v3077_v23 = vpack.c.bf16 %v150_v16, %v149_v14  ;;  %v200_v29 = vld [vmem:[%s5569_s1 + $0x588] sm:$0xff] }
  0x2c   :  { %3058 = vmatprep.subr.bf16.mxu1 %v3057_v19  ;;  %v3045_v19 = vpack.c.bf16 %v118_v13, %v117_v12  ;;  %v133_v22 = vld [vmem:[%s5569_s1 + $0x370] sm:$0xff]  ;;  %v134_v24 = vld [vmem:[%s5569_s1 + $0x378] sm:$0xff]  ;;  %v3047_v30 = vpack.c.bf16 %v102_v21, %v101_v20  ;;  %v151_v34 = vld [vmem:[%s5569_s1 + $0x400] sm:$0xff] }
  0x2d   :  { %3028 = vmatpush3.bf16.msra.mxu0 %v3027_v25  ;;  %v167_v25 = vld [vmem:[%s5569_s1 + $0x480] sm:$0xff]  ;;  %v3079_v32 = vpack.c.bf16 %v134_v24, %v133_v22  ;;  %v152_v35 = vld [vmem:[%s5569_s1 + $0x408] sm:$0xff]  ;;  %v201_v42 = vld [vmem:[%s5569_s1 + $0x590] sm:$0xff] }
  0x2e   :  { %3030 = vmatprep.subr.bf16.mxu0 %v3029_v27  ;;  %v4046_v27 = vsub.s32 4, %v3735_v57  ;;  %v183_v36 = vld [vmem:[%s5569_s1 + $0x500] sm:$0xff]  ;;  %v202_v44 = vld [vmem:[%s5569_s1 + $0x598] sm:$0xff]  ;;  %v3083_v46 = vpack.c.bf16 %v152_v35, %v151_v34  ;;  %v153_v50 = vld [vmem:[%s5569_s1 + $0x410] sm:$0xff] }
  0x2f   :  { %3060 = vmatpush3.bf16.msra.mxu1 %v3059_v26  ;;  %v168_v26 = vld [vmem:[%s5569_s1 + $0x488] sm:$0xff]  ;;  %v171_v55 = vld [vmem:[%s5569_s1 + $0x4a0] sm:$0xff]  ;;  %v173_v8 = vld [vmem:[%s5569_s1 + $0x4b0] sm:$0xff] }
  0x30   :  { %3062 = vmatprep.subr.bf16.mxu1 %v3061_v31  ;;  %v4055_v31 = vsub.s32 6, %v3735_v57  ;;  %v3081_v33 = vpack.c.bf16 %v168_v26, %v167_v25  ;;  %v184_v57 = vld [vmem:[%s5569_s1 + $0x508] sm:$0xff]  ;;  %v636_v41 = vrot.slane %v3785_v15, %v4046_v27  ;;  %v205_v10 = vld [vmem:[%s5569_s1 + $0x5b0] sm:$0xff]  ;;  %v206_v12 = vld [vmem:[%s5569_s1 + $0x5b8] sm:$0xff] }
  0x31   :  { %3032 = vmatpush3.bf16.msra.mxu0 %v3031_v37  ;;  %v3113_v37 = vpack.c.bf16 %v200_v29, %v199_v28  ;;  %v3115_v48 = vpack.c.bf16 %v184_v57, %v183_v36  ;;  %v172_v56 = vld [vmem:[%s5569_s1 + $0x4a8] sm:$0xff]  ;;  %v3125_v20 = vpack.c.bf16 %v206_v12, %v205_v10  ;;  %v190_v21 = vld [vmem:[%s5569_s1 + $0x538] sm:$0xff]  ;;  %v175_v22 = vld [vmem:[%s5569_s1 + $0x4c0] sm:$0xff] }
  0x32   :  { %3034 = vmatprep.subr.bf16.mxu0 %v3033_v40  ;;  %v170_v40 = vld [vmem:[%s5569_s1 + $0x498] sm:$0xff]  ;;  %v644_v47 = vrot.slane %v3785_v15, %v4055_v31  ;;  %v204_v61 = vld [vmem:[%s5569_s1 + $0x5a8] sm:$0xff]  ;;  %v3089_v1 = vpack.c.bf16 %v172_v56, %v171_v55  ;;  %v207_v24 = vld [vmem:[%s5569_s1 + $0x5c0] sm:$0xff] }
  0x33   :  { %3064 = vmatpush3.bf16.msra.mxu1 %v3063_v38  ;;  %v169_v38 = vld [vmem:[%s5569_s1 + $0x490] sm:$0xff]  ;;  %v186_v15 = vld [vmem:[%s5569_s1 + $0x518] sm:$0xff]  ;;  %v188_v7 = vld [vmem:[%s5569_s1 + $0x528] sm:$0xff] }
  0x34   :  { %3066 = vmatprep.subr.bf16.mxu1 %v3065_v45  ;;  %v4086_v45 = vld [vmem:[%s5568_s0 + $0x8] sm:$0xff]  ;;  %v3085_v49 = vpack.c.bf16 %v170_v40, %v169_v38  ;;  %v177_v36 = vld [vmem:[%s5569_s1 + $0x4d0] sm:$0xff]  ;;  %v210_v38 = vld [vmem:[%s5569_s1 + $0x5d8] sm:$0xff] }
  0x35   :  { %3036 = vmatpush3.bf16.msra.mxu0 %v3035_v51  ;;  %v154_v51 = vld [vmem:[%s5569_s1 + $0x418] sm:$0xff]  ;;  %v656_v59 = vrot.slane %v4086_v45, %v3762_v6  ;;  %v664_v62 = vrot.slane %v4086_v45, %v3774_v11  ;;  %v208_v25 = vld [vmem:[%s5569_s1 + $0x5c8] sm:$0xff]  ;;  %v209_v57 = vld [vmem:[%s5569_s1 + $0x5d0] sm:$0xff] }
  0x36   :  { %3038 = vmatprep.subr.bf16.mxu0 %v3037_v54  ;;  %v3117_v54 = vpack.c.bf16 %v202_v44, %v201_v42  ;;  %v3087_v63 = vpack.c.bf16 %v154_v51, %v153_v50  ;;  %v3129_v34 = vpack.c.bf16 %v208_v25, %v207_v24  ;;  %v192_v35 = vld [vmem:[%s5569_s1 + $0x548] sm:$0xff]  ;;  %v161_v44 = vld [vmem:[%s5569_s1 + $0x450] sm:$0xff]  ;;  %v179_v50 = vld [vmem:[%s5569_s1 + $0x4e0] sm:$0xff] }
  0x37   :  { %3068 = vmatpush3.bf16.msra.mxu1 %v3067_v52  ;;  %v185_v52 = vld [vmem:[%s5569_s1 + $0x510] sm:$0xff]  ;;  %v180_v51 = vld [vmem:[%s5569_s1 + $0x4e8] sm:$0xff]  ;;  %v247_v24 = vld [vmem:[%s5569_s1 + $0x700] sm:$0xff] }
  0x38   :  { %3070 = vmatprep.subr.bf16.mxu1 %v3069_v60  ;;  %v203_v60 = vld [vmem:[%s5569_s1 + $0x5a0] sm:$0xff]  ;;  %v3119_v0 = vpack.c.bf16 %v186_v15, %v185_v52  ;;  %v3105_v56 = vpack.c.bf16 %v180_v51, %v179_v50  ;;  %v197_v10 = vld [vmem:[%s5569_s1 + $0x570] sm:$0xff]  ;;  %v680_v50 = vrot.slane %v4086_v45, %v3875_v58 }
  0x39   :  { %3040 = vmatpush3.bf16.msra.mxu0 %v3039_v2  ;;  %v155_v2 = vld [vmem:[%s5569_s1 + $0x420] sm:$0xff]  ;;  %v3121_v5 = vpack.c.bf16 %v204_v61, %v203_v60  ;;  %v164_v60 = vld [vmem:[%s5569_s1 + $0x468] sm:$0xff] }
  0x3a   :  { %3042 = vmatprep.subr.bf16.mxu0 %v3041_v4  ;;  %v187_v4 = vld [vmem:[%s5569_s1 + $0x520] sm:$0xff] }
  0x3b   :  { %3072 = vmatpush3.bf16.msra.mxu1 %v3071_v3  ;;  %v156_v3 = vld [vmem:[%s5569_s1 + $0x428] sm:$0xff]  ;;  %v3123_v14 = vpack.c.bf16 %v188_v7, %v187_v4  ;;  %v211_v52 = vld [vmem:[%s5569_s1 + $0x5e0] sm:$0xff] }
  0x3c   :  { %3074 = vmatprep.subr.bf16.mxu1 %v3073_v9  ;;  %v174_v9 = vld [vmem:[%s5569_s1 + $0x4b8] sm:$0xff]  ;;  %v3091_v13 = vpack.c.bf16 %v156_v3, %v155_v2  ;;  %v195_v61 = vld [vmem:[%s5569_s1 + $0x560] sm:$0xff]  ;;  %v213_v2 = vld [vmem:[%s5569_s1 + $0x5f0] sm:$0xff] }
  0x3d   :  { %3044 = vmatpush3.bf16.msra.mxu0 %v3043_v17  ;;  %v3093_v16 = vpack.c.bf16 %v174_v9, %v173_v8  ;;  %v157_v17 = vld [vmem:[%s5569_s1 + $0x430] sm:$0xff]  ;;  %v214_v3 = vld [vmem:[%s5569_s1 + $0x5f8] sm:$0xff] }
  0x3e   :  { %3046 = vmatprep.subr.bf16.mxu0 %v3045_v19  ;;  %v189_v19 = vld [vmem:[%s5569_s1 + $0x530] sm:$0xff]  ;;  %v166_v9 = vld [vmem:[%s5569_s1 + $0x478] sm:$0xff]  ;;  %v3141_v12 = vpack.c.bf16 %v214_v3, %v213_v2 }
  0x3f   :  { %3076 = vmatpush3.bf16.msra.mxu1 %v3075_v18  ;;  %v158_v18 = vld [vmem:[%s5569_s1 + $0x438] sm:$0xff]  ;;  %v3127_v28 = vpack.c.bf16 %v190_v21, %v189_v19  ;;  %v165_v8 = vld [vmem:[%s5569_s1 + $0x470] sm:$0xff] }
  0x40   :  { %3078 = vmatprep.subr.bf16.mxu1 %v3077_v23  ;;  %v176_v23 = vld [vmem:[%s5569_s1 + $0x4c8] sm:$0xff]  ;;  %v3095_v26 = vpack.c.bf16 %v158_v18, %v157_v17  ;;  %v263_v17 = vld [vmem:[%s5569_s1 + $0x780] sm:$0xff]  ;;  %v3111_v19 = vpack.c.bf16 %v166_v9, %v165_v8  ;;  %v254_v9 = vld [vmem:[%s5569_s1 + $0x738] sm:$0xff] }
  0x41   :  { %3048 = vmatpush3.bf16.msra.mxu0 %v3047_v30  ;;  %v3097_v29 = vpack.c.bf16 %v176_v23, %v175_v22  ;;  %v159_v30 = vld [vmem:[%s5569_s1 + $0x440] sm:$0xff]  ;;  %v264_v18 = vld [vmem:[%s5569_s1 + $0x788] sm:$0xff] }
  0x42   :  { %3082 = vmatprep.subr.bf16.mxu0 %v3081_v33  ;;  %v191_v33 = vld [vmem:[%s5569_s1 + $0x540] sm:$0xff]  ;;  %v216_v23 = vld [vmem:[%s5569_s1 + $0x608] sm:$0xff]  ;;  %v3177_v25 = vpack.c.bf16 %v264_v18, %v263_v17 }
  0x43   :  { %3080 = vmatpush3.bf16.msra.mxu1 %v3079_v32  ;;  %v160_v32 = vld [vmem:[%s5569_s1 + $0x448] sm:$0xff]  ;;  %v215_v22 = vld [vmem:[%s5569_s1 + $0x600] sm:$0xff] }
  0x44   :  { %3114 = vmatprep.subr.bf16.mxu1 %v3113_v37  ;;  %1009 = vmatmul.mubr.f32.vlgmr.msra.gmra.mrb[2].mxu0 %v636_v41  ;;  %v178_v37 = vld [vmem:[%s5569_s1 + $0x4d8] sm:$0xff]  ;;  %v3099_v40 = vpack.c.bf16 %v160_v32, %v159_v30  ;;  %v3131_v41 = vpack.c.bf16 %v192_v35, %v191_v33  ;;  %v652_v30 = vrot.slane %v4086_v45, %v3834_v39  ;;  %v265_v32 = vld [vmem:[%s5569_s1 + $0x790] sm:$0xff] }
  0x45   :  { %3084 = vmatpush3.bf16.msra.mxu0 %v3083_v46  ;;  %1148 = vmatprep.mubr.f32.mxu0 %v656_v59  ;;  %v3101_v42 = vpack.c.bf16 %v178_v37, %v177_v36  ;;  %v162_v46 = vld [vmem:[%s5569_s1 + $0x458] sm:$0xff]  ;;  %v163_v59 = vld [vmem:[%s5569_s1 + $0x460] sm:$0xff]  ;;  %v660_v35 = vrot.slane %v4086_v45, %v3843_v43 }
  0x46   :  { %1079 = vmatmul.mubr.f32.vlgmr.msra.gmra.mrb[2].mxu1 %v644_v47  ;;  %3086 = vmatprep.subr.bf16.mxu0 %v3085_v49  ;;  %v193_v47 = vld [vmem:[%s5569_s1 + $0x550] sm:$0xff]  ;;  %v194_v49 = vld [vmem:[%s5569_s1 + $0x558] sm:$0xff]  ;;  %v3103_v15 = vpack.c.bf16 %v162_v46, %v161_v44  ;;  %v3107_v4 = vpack.c.bf16 %v164_v60, %v163_v59  ;;  %v235_v44 = vld [vmem:[%s5569_s1 + $0x6a0] sm:$0xff] }
  0x47   :  { %3116 = vmatpush3.bf16.msra.mxu1 %v3115_v48  ;;  %1218 = vmatprep.mubr.f32.mxu1 %v664_v62  ;;  %v3133_v48 = vpack.c.bf16 %v210_v38, %v209_v57  ;;  %v3135_v55 = vpack.c.bf16 %v194_v49, %v193_v47  ;;  %v266_v33 = vld [vmem:[%s5569_s1 + $0x798] sm:$0xff]  ;;  %v217_v57 = vld [vmem:[%s5569_s1 + $0x610] sm:$0xff]  ;;  %v236_v46 = vld [vmem:[%s5569_s1 + $0x6a8] sm:$0xff]  ;;  %v672_v47 = vrot.slane %v4086_v45, %v3864_v53 }
  0x48   :  { %3118 = vmatprep.subr.bf16.mxu1 %v3117_v54  ;;  %v212_v54 = vld [vmem:[%s5569_s1 + $0x5e8] sm:$0xff]  ;;  %v218_v38 = vld [vmem:[%s5569_s1 + $0x618] sm:$0xff] }
  0x49   :  { %3088 = vmatpush3.bf16.msra.mxu0 %v3087_v63  ;;  %v3137_v62 = vpack.c.bf16 %v212_v54, %v211_v52  ;;  %v196_v63 = vld [vmem:[%s5569_s1 + $0x568] sm:$0xff]  ;;  %v3151_v51 = vpack.c.bf16 %v218_v38, %v217_v57  ;;  %v3153_v54 = vpack.c.bf16 %v236_v46, %v235_v44  ;;  %v243_v57 = vld [vmem:[%s5569_s1 + $0x6e0] sm:$0xff] }
  0x4a   :  { %3090 = vmatprep.subr.bf16.mxu0 %v3089_v1  ;;  %v182_v1 = vld [vmem:[%s5569_s1 + $0x4f8] sm:$0xff]  ;;  %v268_v49 = vld [vmem:[%s5569_s1 + $0x7a8] sm:$0xff] }
  0x4b   :  { %3120 = vmatpush3.bf16.msra.mxu1 %v3119_v0  ;;  %v181_v0 = vld [vmem:[%s5569_s1 + $0x4f0] sm:$0xff]  ;;  %v252_v60 = vld [vmem:[%s5569_s1 + $0x728] sm:$0xff] }
  0x4c   :  { %3122 = vmatprep.subr.bf16.mxu1 %v3121_v5  ;;  %v3139_v5 = vpack.c.bf16 %v196_v63, %v195_v61  ;;  %v3109_v7 = vpack.c.bf16 %v182_v1, %v181_v0  ;;  %v237_v61 = vld [vmem:[%s5569_s1 + $0x6b0] sm:$0xff]  ;;  %v270_v0 = vld [vmem:[%s5569_s1 + $0x7b8] sm:$0xff]  ;;  %v244_v38 = vld [vmem:[%s5569_s1 + $0x6e8] sm:$0xff] }
  0x4d   :  { %3092 = vmatpush3.bf16.msra.mxu0 %v3091_v13  ;;  %v198_v13 = vld [vmem:[%s5569_s1 + $0x578] sm:$0xff]  ;;  %v269_v63 = vld [vmem:[%s5569_s1 + $0x7b0] sm:$0xff]  ;;  %v3169_v46 = vpack.c.bf16 %v244_v38, %v243_v57 }
  0x4e   :  { %3094 = vmatprep.subr.bf16.mxu0 %v3093_v16  ;;  %v232_v16 = vld [vmem:[%s5569_s1 + $0x688] sm:$0xff]  ;;  %v3189_v8 = vpack.c.bf16 %v270_v0, %v269_v63  ;;  %v261_v63 = vld [vmem:[%s5569_s1 + $0x770] sm:$0xff] }
  0x4f   :  { %3124 = vmatpush3.bf16.msra.mxu1 %v3123_v14  ;;  %v231_v14 = vld [vmem:[%s5569_s1 + $0x680] sm:$0xff] }
  0x50   :  { %3126 = vmatprep.subr.bf16.mxu1 %v3125_v20  ;;  %v3143_v20 = vpack.c.bf16 %v198_v13, %v197_v10  ;;  %v3145_v21 = vpack.c.bf16 %v232_v16, %v231_v14  ;;  %v239_v10 = vld [vmem:[%s5569_s1 + $0x6c0] sm:$0xff]  ;;  %v272_v14 = vld [vmem:[%s5569_s1 + $0x7c8] sm:$0xff] }
  0x51   :  { %3096 = vmatpush3.bf16.msra.mxu0 %v3095_v26  ;;  %v248_v26 = vld [vmem:[%s5569_s1 + $0x708] sm:$0xff]  ;;  %v271_v13 = vld [vmem:[%s5569_s1 + $0x7c0] sm:$0xff] }
  0x52   :  { %3098 = vmatprep.subr.bf16.mxu0 %v3097_v29  ;;  %v234_v29 = vld [vmem:[%s5569_s1 + $0x698] sm:$0xff]  ;;  %v3179_v36 = vpack.c.bf16 %v248_v26, %v247_v24  ;;  %v241_v24 = vld [vmem:[%s5569_s1 + $0x6d0] sm:$0xff] }
  0x53   :  { %3128 = vmatpush3.bf16.msra.mxu1 %v3127_v28  ;;  %v233_v28 = vld [vmem:[%s5569_s1 + $0x690] sm:$0xff] }
  0x54   :  { %3130 = vmatprep.subr.bf16.mxu1 %v3129_v34  ;;  %v3147_v34 = vpack.c.bf16 %v216_v23, %v215_v22  ;;  %v3149_v37 = vpack.c.bf16 %v234_v29, %v233_v28  ;;  %v3193_v22 = vpack.c.bf16 %v272_v14, %v271_v13  ;;  %v256_v23 = vld [vmem:[%s5569_s1 + $0x748] sm:$0xff]  ;;  %v273_v26 = vld [vmem:[%s5569_s1 + $0x7d0] sm:$0xff]  ;;  %v274_v28 = vld [vmem:[%s5569_s1 + $0x7d8] sm:$0xff] }
  0x55   :  { %3100 = vmatpush3.bf16.msra.mxu0 %v3099_v40  ;;  %v249_v40 = vld [vmem:[%s5569_s1 + $0x710] sm:$0xff]  ;;  %v311_v13 = vld [vmem:[%s5569_s1 + $0x900] sm:$0xff] }
  0x56   :  { %3102 = vmatprep.subr.bf16.mxu0 %v3101_v42  ;;  %v250_v42 = vld [vmem:[%s5569_s1 + $0x718] sm:$0xff] }
  0x57   :  { %3132 = vmatpush3.bf16.msra.mxu1 %v3131_v41  ;;  %v3181_v41 = vpack.c.bf16 %v266_v33, %v265_v32  ;;  %v3183_v52 = vpack.c.bf16 %v250_v42, %v249_v40  ;;  %v225_v33 = vld [vmem:[%s5569_s1 + $0x650] sm:$0xff]  ;;  %v275_v40 = vld [vmem:[%s5569_s1 + $0x7e0] sm:$0xff] }
  0x58   :  { %3134 = vmatprep.subr.bf16.mxu1 %v3133_v48  ;;  %v267_v48 = vld [vmem:[%s5569_s1 + $0x7a0] sm:$0xff] }
  0x59   :  { %3104 = vmatpush3.bf16.msra.mxu0 %v3103_v15  ;;  %v219_v15 = vld [vmem:[%s5569_s1 + $0x620] sm:$0xff]  ;;  %v3185_v59 = vpack.c.bf16 %v268_v49, %v267_v48  ;;  %v228_v48 = vld [vmem:[%s5569_s1 + $0x668] sm:$0xff] }
  0x5a   :  { %3106 = vmatprep.subr.bf16.mxu0 %v3105_v56  ;;  %v251_v56 = vld [vmem:[%s5569_s1 + $0x720] sm:$0xff] }
  0x5b   :  { %3136 = vmatpush3.bf16.msra.mxu1 %v3135_v55  ;;  %v220_v55 = vld [vmem:[%s5569_s1 + $0x628] sm:$0xff]  ;;  %v3187_v2 = vpack.c.bf16 %v252_v60, %v251_v56  ;;  %v259_v49 = vld [vmem:[%s5569_s1 + $0x760] sm:$0xff] }
  0x5c   :  { %3138 = vmatprep.subr.bf16.mxu1 %v3137_v62  ;;  %v238_v62 = vld [vmem:[%s5569_s1 + $0x6b8] sm:$0xff]  ;;  %v3155_v1 = vpack.c.bf16 %v220_v55, %v219_v15  ;;  %v277_v15 = vld [vmem:[%s5569_s1 + $0x7f0] sm:$0xff] }
  0x5d   :  { %3108 = vmatpush3.bf16.msra.mxu0 %v3107_v4  ;;  %v3157_v3 = vpack.c.bf16 %v238_v62, %v237_v61  ;;  %v221_v4 = vld [vmem:[%s5569_s1 + $0x630] sm:$0xff]  ;;  %v278_v55 = vld [vmem:[%s5569_s1 + $0x7f8] sm:$0xff] }
  0x5e   :  { %3110 = vmatprep.subr.bf16.mxu0 %v3109_v7  ;;  %v253_v7 = vld [vmem:[%s5569_s1 + $0x730] sm:$0xff]  ;;  %v230_v62 = vld [vmem:[%s5569_s1 + $0x678] sm:$0xff]  ;;  %v3205_v0 = vpack.c.bf16 %v278_v55, %v277_v15 }
  0x5f   :  { %3140 = vmatpush3.bf16.msra.mxu1 %v3139_v5  ;;  %v222_v5 = vld [vmem:[%s5569_s1 + $0x638] sm:$0xff]  ;;  %v3191_v17 = vpack.c.bf16 %v254_v9, %v253_v7  ;;  %v229_v61 = vld [vmem:[%s5569_s1 + $0x670] sm:$0xff] }
  0x60   :  { %3142 = vmatprep.subr.bf16.mxu1 %v3141_v12  ;;  %v240_v12 = vld [vmem:[%s5569_s1 + $0x6c8] sm:$0xff]  ;;  %v3159_v16 = vpack.c.bf16 %v222_v5, %v221_v4  ;;  %v327_v4 = vld [vmem:[%s5569_s1 + $0x980] sm:$0xff]  ;;  %v3175_v7 = vpack.c.bf16 %v230_v62, %v229_v61  ;;  %v318_v62 = vld [vmem:[%s5569_s1 + $0x938] sm:$0xff] }
  0x61   :  { %3112 = vmatpush3.bf16.msra.mxu0 %v3111_v19  ;;  %v3161_v18 = vpack.c.bf16 %v240_v12, %v239_v10  ;;  %v223_v19 = vld [vmem:[%s5569_s1 + $0x640] sm:$0xff]  ;;  %v328_v5 = vld [vmem:[%s5569_s1 + $0x988] sm:$0xff] }
  0x62   :  { %3146 = vmatprep.subr.bf16.mxu0 %v3145_v21  ;;  %v255_v21 = vld [vmem:[%s5569_s1 + $0x740] sm:$0xff]  ;;  %v280_v12 = vld [vmem:[%s5569_s1 + $0x808] sm:$0xff]  ;;  %v3241_v14 = vpack.c.bf16 %v328_v5, %v327_v4 }
  0x63   :  { %3144 = vmatpush3.bf16.msra.mxu1 %v3143_v20  ;;  %v224_v20 = vld [vmem:[%s5569_s1 + $0x648] sm:$0xff]  ;;  %v279_v10 = vld [vmem:[%s5569_s1 + $0x800] sm:$0xff] }
  0x64   :  { %3178 = vmatprep.subr.bf16.mxu1 %v3177_v25  ;;  %1149 = vmatmul.mubr.f32.vlgmr.msra.gmra.mrb[4].mxu0 %v652_v30  ;;  %v242_v25 = vld [vmem:[%s5569_s1 + $0x6d8] sm:$0xff]  ;;  %v3163_v29 = vpack.c.bf16 %v224_v20, %v223_v19  ;;  %v3195_v30 = vpack.c.bf16 %v256_v23, %v255_v21  ;;  %v668_v19 = vrot.slane %v4086_v45, %v4046_v27  ;;  %v329_v20 = vld [vmem:[%s5569_s1 + $0x990] sm:$0xff] }
  0x65   :  { %3148 = vmatpush3.bf16.msra.mxu0 %v3147_v34  ;;  %1288 = vmatprep.mubr.f32.mxu0 %v672_v47  ;;  %v3165_v32 = vpack.c.bf16 %v242_v25, %v241_v24  ;;  %v226_v34 = vld [vmem:[%s5569_s1 + $0x658] sm:$0xff]  ;;  %v227_v47 = vld [vmem:[%s5569_s1 + $0x660] sm:$0xff]  ;;  %v3211_v23 = vpack.c.bf16 %v280_v12, %v279_v10  ;;  %v676_v24 = vrot.slane %v4086_v45, %v4055_v31  ;;  %v320_v12 = vld [vmem:[%s5569_s1 + $0x948] sm:$0xff] }
  0x66   :  { %1219 = vmatmul.mubr.f32.vlgmr.msra.gmra.mrb[4].mxu1 %v660_v35  ;;  %3150 = vmatprep.subr.bf16.mxu0 %v3149_v37  ;;  %v257_v35 = vld [vmem:[%s5569_s1 + $0x750] sm:$0xff]  ;;  %v258_v37 = vld [vmem:[%s5569_s1 + $0x758] sm:$0xff]  ;;  %v3167_v42 = vpack.c.bf16 %v226_v34, %v225_v33  ;;  %v3171_v56 = vpack.c.bf16 %v228_v48, %v227_v47  ;;  %v299_v33 = vld [vmem:[%s5569_s1 + $0x8a0] sm:$0xff] }
  0x67   :  { %3180 = vmatpush3.bf16.msra.mxu1 %v3179_v36  ;;  %1358 = vmatprep.mubr.f32.mxu1 %v680_v50  ;;  %v3197_v36 = vpack.c.bf16 %v274_v28, %v273_v26  ;;  %v3199_v44 = vpack.c.bf16 %v258_v37, %v257_v35  ;;  %v330_v21 = vld [vmem:[%s5569_s1 + $0x998] sm:$0xff]  ;;  %v281_v28 = vld [vmem:[%s5569_s1 + $0x810] sm:$0xff]  ;;  %v300_v34 = vld [vmem:[%s5569_s1 + $0x8a8] sm:$0xff] }
  0x68   :  { %3182 = vmatprep.subr.bf16.mxu1 %v3181_v41  ;;  %v276_v41 = vld [vmem:[%s5569_s1 + $0x7e8] sm:$0xff]  ;;  %v314_v45 = vld [vmem:[%s5569_s1 + $0x918] sm:$0xff] }
  0x69   :  { %3152 = vmatpush3.bf16.msra.mxu0 %v3151_v51  ;;  %v3201_v50 = vpack.c.bf16 %v276_v41, %v275_v40  ;;  %v260_v51 = vld [vmem:[%s5569_s1 + $0x768] sm:$0xff]  ;;  %v3217_v41 = vpack.c.bf16 %v300_v34, %v299_v33 }
  0x6a   :  { %3154 = vmatprep.subr.bf16.mxu0 %v3153_v54  ;;  %v246_v54 = vld [vmem:[%s5569_s1 + $0x6f8] sm:$0xff]  ;;  %v332_v37 = vld [vmem:[%s5569_s1 + $0x9a8] sm:$0xff] }
  0x6b   :  { %3184 = vmatpush3.bf16.msra.mxu1 %v3183_v52  ;;  %v245_v52 = vld [vmem:[%s5569_s1 + $0x6f0] sm:$0xff]  ;;  %v316_v48 = vld [vmem:[%s5569_s1 + $0x928] sm:$0xff] }
  0x6c   :  { %3186 = vmatprep.subr.bf16.mxu1 %v3185_v59  ;;  %v3203_v59 = vpack.c.bf16 %v260_v51, %v259_v49  ;;  %v3173_v60 = vpack.c.bf16 %v246_v54, %v245_v52  ;;  %v301_v49 = vld [vmem:[%s5569_s1 + $0x8b0] sm:$0xff]  ;;  %v334_v52 = vld [vmem:[%s5569_s1 + $0x9b8] sm:$0xff] }
  0x6d   :  { %3156 = vmatpush3.bf16.msra.mxu0 %v3155_v1  ;;  %v262_v1 = vld [vmem:[%s5569_s1 + $0x778] sm:$0xff]  ;;  %v333_v51 = vld [vmem:[%s5569_s1 + $0x9b0] sm:$0xff] }
  0x6e   :  { %3158 = vmatprep.subr.bf16.mxu0 %v3157_v3  ;;  %v296_v3 = vld [vmem:[%s5569_s1 + $0x888] sm:$0xff]  ;;  %v3253_v61 = vpack.c.bf16 %v334_v52, %v333_v51  ;;  %v325_v51 = vld [vmem:[%s5569_s1 + $0x970] sm:$0xff] }
  0x6f   :  { %3188 = vmatpush3.bf16.msra.mxu1 %v3187_v2  ;;  %v295_v2 = vld [vmem:[%s5569_s1 + $0x880] sm:$0xff] }
  0x70   :  { %3190 = vmatprep.subr.bf16.mxu1 %v3189_v8  ;;  %v3207_v8 = vpack.c.bf16 %v262_v1, %v261_v63  ;;  %v3209_v9 = vpack.c.bf16 %v296_v3, %v295_v2  ;;  %v303_v63 = vld [vmem:[%s5569_s1 + $0x8c0] sm:$0xff]  ;;  %v336_v2 = vld [vmem:[%s5569_s1 + $0x9c8] sm:$0xff] }
  0x71   :  { %3160 = vmatpush3.bf16.msra.mxu0 %v3159_v16  ;;  %v312_v16 = vld [vmem:[%s5569_s1 + $0x908] sm:$0xff]  ;;  %v335_v1 = vld [vmem:[%s5569_s1 + $0x9c0] sm:$0xff] }
  0x72   :  { %3162 = vmatprep.subr.bf16.mxu0 %v3161_v18  ;;  %v298_v18 = vld [vmem:[%s5569_s1 + $0x898] sm:$0xff]  ;;  %v3243_v25 = vpack.c.bf16 %v312_v16, %v311_v13  ;;  %v3257_v10 = vpack.c.bf16 %v336_v2, %v335_v1  ;;  %v305_v13 = vld [vmem:[%s5569_s1 + $0x8d0] sm:$0xff]  ;;  %v375_v1 = vld [vmem:[%s5569_s1 + $0xb00] sm:$0xff] }
  0x73   :  { %3192 = vmatpush3.bf16.msra.mxu1 %v3191_v17  ;;  %v297_v17 = vld [vmem:[%s5569_s1 + $0x890] sm:$0xff] }
  0x74   :  { %3194 = vmatprep.subr.bf16.mxu1 %v3193_v22  ;;  %v4491_v22 = vld [vmem:[%s5568_s0 + $0x10] sm:$0xff]  ;;  %v3213_v26 = vpack.c.bf16 %v298_v18, %v297_v17  ;;  %v338_v17 = vld [vmem:[%s5569_s1 + $0x9d8] sm:$0xff] }
  0x75   :  { %3164 = vmatpush3.bf16.msra.mxu0 %v3163_v29  ;;  %v282_v29 = vld [vmem:[%s5569_s1 + $0x818] sm:$0xff]  ;;  %v688_v35 = vrot.slane %v4491_v22, %v3762_v6  ;;  %v696_v57 = vrot.slane %v4491_v22, %v3774_v11  ;;  %v337_v16 = vld [vmem:[%s5569_s1 + $0x9d0] sm:$0xff] }
  0x76   :  { %3166 = vmatprep.subr.bf16.mxu0 %v3165_v32  ;;  %v3245_v32 = vpack.c.bf16 %v330_v21, %v329_v20  ;;  %v3215_v38 = vpack.c.bf16 %v282_v29, %v281_v28  ;;  %v289_v21 = vld [vmem:[%s5569_s1 + $0x850] sm:$0xff]  ;;  %v307_v28 = vld [vmem:[%s5569_s1 + $0x8e0] sm:$0xff]  ;;  %v308_v29 = vld [vmem:[%s5569_s1 + $0x8e8] sm:$0xff] }
  0x77   :  { %3196 = vmatpush3.bf16.msra.mxu1 %v3195_v30  ;;  %v313_v30 = vld [vmem:[%s5569_s1 + $0x910] sm:$0xff]  ;;  %v3233_v34 = vpack.c.bf16 %v308_v29, %v307_v28  ;;  %v712_v28 = vrot.slane %v4491_v22, %v3875_v58 }
  0x78   :  { %3198 = vmatprep.subr.bf16.mxu1 %v3197_v36  ;;  %v331_v36 = vld [vmem:[%s5569_s1 + $0x9a0] sm:$0xff]  ;;  %v3247_v40 = vpack.c.bf16 %v314_v45, %v313_v30 }
  0x79   :  { %3168 = vmatpush3.bf16.msra.mxu0 %v3167_v42  ;;  %v283_v42 = vld [vmem:[%s5569_s1 + $0x820] sm:$0xff]  ;;  %v3249_v47 = vpack.c.bf16 %v332_v37, %v331_v36  ;;  %v292_v36 = vld [vmem:[%s5569_s1 + $0x868] sm:$0xff] }
  0x7a   :  { %3170 = vmatprep.subr.bf16.mxu0 %v3169_v46  ;;  %v315_v46 = vld [vmem:[%s5569_s1 + $0x920] sm:$0xff] }
  0x7b   :  { %3200 = vmatpush3.bf16.msra.mxu1 %v3199_v44  ;;  %v284_v44 = vld [vmem:[%s5569_s1 + $0x828] sm:$0xff]  ;;  %v3251_v15 = vpack.c.bf16 %v316_v48, %v315_v46  ;;  %v339_v30 = vld [vmem:[%s5569_s1 + $0x9e0] sm:$0xff] }
  0x7c   :  { %3202 = vmatprep.subr.bf16.mxu1 %v3201_v50  ;;  %v302_v50 = vld [vmem:[%s5569_s1 + $0x8b8] sm:$0xff]  ;;  %v3219_v54 = vpack.c.bf16 %v284_v44, %v283_v42  ;;  %v323_v37 = vld [vmem:[%s5569_s1 + $0x960] sm:$0xff]  ;;  %v341_v42 = vld [vmem:[%s5569_s1 + $0x9f0] sm:$0xff] }
  0x7d   :  { %3172 = vmatpush3.bf16.msra.mxu0 %v3171_v56  ;;  %v3221_v55 = vpack.c.bf16 %v302_v50, %v301_v49  ;;  %v285_v56 = vld [vmem:[%s5569_s1 + $0x830] sm:$0xff]  ;;  %v342_v44 = vld [vmem:[%s5569_s1 + $0x9f8] sm:$0xff] }
  0x7e   :  { %3174 = vmatprep.subr.bf16.mxu0 %v3173_v60  ;;  %v317_v60 = vld [vmem:[%s5569_s1 + $0x930] sm:$0xff]  ;;  %v294_v50 = vld [vmem:[%s5569_s1 + $0x878] sm:$0xff]  ;;  %v3269_v52 = vpack.c.bf16 %v342_v44, %v341_v42 }
  0x7f   :  { %3204 = vmatpush3.bf16.msra.mxu1 %v3203_v59  ;;  %v286_v59 = vld [vmem:[%s5569_s1 + $0x838] sm:$0xff]  ;;  %v3255_v4 = vpack.c.bf16 %v318_v62, %v317_v60  ;;  %v293_v49 = vld [vmem:[%s5569_s1 + $0x870] sm:$0xff] }
  0x80   :  { %3206 = vmatprep.subr.bf16.mxu1 %v3205_v0  ;;  %v304_v0 = vld [vmem:[%s5569_s1 + $0x8c8] sm:$0xff]  ;;  %v3223_v3 = vpack.c.bf16 %v286_v59, %v285_v56  ;;  %v391_v56 = vld [vmem:[%s5569_s1 + $0xb80] sm:$0xff]  ;;  %v3239_v60 = vpack.c.bf16 %v294_v50, %v293_v49  ;;  %v382_v50 = vld [vmem:[%s5569_s1 + $0xb38] sm:$0xff] }
  0x81   :  { %3176 = vmatpush3.bf16.msra.mxu0 %v3175_v7  ;;  %v3225_v5 = vpack.c.bf16 %v304_v0, %v303_v63  ;;  %v287_v7 = vld [vmem:[%s5569_s1 + $0x840] sm:$0xff]  ;;  %v392_v59 = vld [vmem:[%s5569_s1 + $0xb88] sm:$0xff] }
  0x82   :  { %3210 = vmatprep.subr.bf16.mxu0 %v3209_v9  ;;  %v319_v9 = vld [vmem:[%s5569_s1 + $0x940] sm:$0xff]  ;;  %v344_v0 = vld [vmem:[%s5569_s1 + $0xa08] sm:$0xff]  ;;  %v3305_v2 = vpack.c.bf16 %v392_v59, %v391_v56 }
  0x83   :  { %3208 = vmatpush3.bf16.msra.mxu1 %v3207_v8  ;;  %v288_v8 = vld [vmem:[%s5569_s1 + $0x848] sm:$0xff]  ;;  %v343_v63 = vld [vmem:[%s5569_s1 + $0xa00] sm:$0xff] }
  0x84   :  { %3242 = vmatprep.subr.bf16.mxu1 %v3241_v14  ;;  %1289 = vmatmul.mubr.f32.vlgmr.msra.gmra.mrb[6].mxu0 %v668_v19  ;;  %v306_v14 = vld [vmem:[%s5569_s1 + $0x8d8] sm:$0xff]  ;;  %v3227_v18 = vpack.c.bf16 %v288_v8, %v287_v7  ;;  %v3259_v19 = vpack.c.bf16 %v320_v12, %v319_v9  ;;  %v684_v7 = vrot.slane %v4491_v22, %v3834_v39  ;;  %v393_v8 = vld [vmem:[%s5569_s1 + $0xb90] sm:$0xff] }
  0x85   :  { %3212 = vmatpush3.bf16.msra.mxu0 %v3211_v23  ;;  %1428 = vmatprep.mubr.f32.mxu0 %v688_v35  ;;  %v3229_v20 = vpack.c.bf16 %v306_v14, %v305_v13  ;;  %v290_v23 = vld [vmem:[%s5569_s1 + $0x858] sm:$0xff]  ;;  %v291_v35 = vld [vmem:[%s5569_s1 + $0x860] sm:$0xff]  ;;  %v692_v12 = vrot.slane %v4491_v22, %v3843_v43 }
  0x86   :  { %1359 = vmatmul.mubr.f32.vlgmr.msra.gmra.mrb[6].mxu1 %v676_v24  ;;  %3214 = vmatprep.subr.bf16.mxu0 %v3213_v26  ;;  %v321_v24 = vld [vmem:[%s5569_s1 + $0x950] sm:$0xff]  ;;  %v322_v26 = vld [vmem:[%s5569_s1 + $0x958] sm:$0xff]  ;;  %v3231_v45 = vpack.c.bf16 %v290_v23, %v289_v21  ;;  %v3235_v46 = vpack.c.bf16 %v292_v36, %v291_v35  ;;  %v363_v21 = vld [vmem:[%s5569_s1 + $0xaa0] sm:$0xff] }
  0x87   :  { %3244 = vmatpush3.bf16.msra.mxu1 %v3243_v25  ;;  %1498 = vmatprep.mubr.f32.mxu1 %v696_v57  ;;  %v3261_v25 = vpack.c.bf16 %v338_v17, %v337_v16  ;;  %v3263_v33 = vpack.c.bf16 %v322_v26, %v321_v24  ;;  %v394_v9 = vld [vmem:[%s5569_s1 + $0xb98] sm:$0xff]  ;;  %v345_v16 = vld [vmem:[%s5569_s1 + $0xa10] sm:$0xff]  ;;  %v364_v23 = vld [vmem:[%s5569_s1 + $0xaa8] sm:$0xff]  ;;  %v704_v24 = vrot.slane %v4491_v22, %v3864_v53 }
  0x88   :  { %3246 = vmatprep.subr.bf16.mxu1 %v3245_v32  ;;  %v340_v32 = vld [vmem:[%s5569_s1 + $0x9e8] sm:$0xff]  ;;  %v346_v17 = vld [vmem:[%s5569_s1 + $0xa18] sm:$0xff] }
  0x89   :  { %3216 = vmatpush3.bf16.msra.mxu0 %v3215_v38  ;;  %v3265_v57 = vpack.c.bf16 %v340_v32, %v339_v30  ;;  %v324_v38 = vld [vmem:[%s5569_s1 + $0x968] sm:$0xff]  ;;  %v3279_v29 = vpack.c.bf16 %v346_v17, %v345_v16  ;;  %v3281_v32 = vpack.c.bf16 %v364_v23, %v363_v21  ;;  %v371_v16 = vld [vmem:[%s5569_s1 + $0xae0] sm:$0xff] }
  0x8a   :  { %3218 = vmatprep.subr.bf16.mxu0 %v3217_v41  ;;  %v310_v41 = vld [vmem:[%s5569_s1 + $0x8f8] sm:$0xff]  ;;  %v396_v26 = vld [vmem:[%s5569_s1 + $0xba8] sm:$0xff] }
  0x8b   :  { %3248 = vmatpush3.bf16.msra.mxu1 %v3247_v40  ;;  %v309_v40 = vld [vmem:[%s5569_s1 + $0x8f0] sm:$0xff]  ;;  %v380_v36 = vld [vmem:[%s5569_s1 + $0xb28] sm:$0xff] }
  0x8c   :  { %3250 = vmatprep.subr.bf16.mxu1 %v3249_v47  ;;  %v3267_v47 = vpack.c.bf16 %v324_v38, %v323_v37  ;;  %v3237_v48 = vpack.c.bf16 %v310_v41, %v309_v40  ;;  %v365_v37 = vld [vmem:[%s5569_s1 + $0xab0] sm:$0xff]  ;;  %v398_v40 = vld [vmem:[%s5569_s1 + $0xbb8] sm:$0xff]  ;;  %v372_v17 = vld [vmem:[%s5569_s1 + $0xae8] sm:$0xff] }
  0x8d   :  { %3220 = vmatpush3.bf16.msra.mxu0 %v3219_v54  ;;  %v326_v54 = vld [vmem:[%s5569_s1 + $0x978] sm:$0xff]  ;;  %v397_v38 = vld [vmem:[%s5569_s1 + $0xbb0] sm:$0xff]  ;;  %v3297_v23 = vpack.c.bf16 %v372_v17, %v371_v16 }
  0x8e   :  { %3222 = vmatprep.subr.bf16.mxu0 %v3221_v55  ;;  %v360_v55 = vld [vmem:[%s5569_s1 + $0xa88] sm:$0xff]  ;;  %v3317_v49 = vpack.c.bf16 %v398_v40, %v397_v38  ;;  %v389_v38 = vld [vmem:[%s5569_s1 + $0xb70] sm:$0xff] }
  0x8f   :  { %3252 = vmatpush3.bf16.msra.mxu1 %v3251_v15  ;;  %v359_v15 = vld [vmem:[%s5569_s1 + $0xa80] sm:$0xff] }
  0x90   :  { %3254 = vmatprep.subr.bf16.mxu1 %v3253_v61  ;;  %v3271_v61 = vpack.c.bf16 %v326_v54, %v325_v51  ;;  %v3273_v62 = vpack.c.bf16 %v360_v55, %v359_v15  ;;  %v367_v51 = vld [vmem:[%s5569_s1 + $0xac0] sm:$0xff]  ;;  %v400_v15 = vld [vmem:[%s5569_s1 + $0xbc8] sm:$0xff] }
  0x91   :  { %3224 = vmatpush3.bf16.msra.mxu0 %v3223_v3  ;;  %v376_v3 = vld [vmem:[%s5569_s1 + $0xb08] sm:$0xff]  ;;  %v399_v54 = vld [vmem:[%s5569_s1 + $0xbc0] sm:$0xff] }
  0x92   :  { %3226 = vmatprep.subr.bf16.mxu0 %v3225_v5  ;;  %v362_v5 = vld [vmem:[%s5569_s1 + $0xa98] sm:$0xff]  ;;  %v3307_v13 = vpack.c.bf16 %v376_v3, %v375_v1  ;;  %v369_v1 = vld [vmem:[%s5569_s1 + $0xad0] sm:$0xff] }
  0x93   :  { %3256 = vmatpush3.bf16.msra.mxu1 %v3255_v4  ;;  %v361_v4 = vld [vmem:[%s5569_s1 + $0xa90] sm:$0xff] }
  0x94   :  { %3258 = vmatprep.subr.bf16.mxu1 %v3257_v10  ;;  %v3275_v10 = vpack.c.bf16 %v344_v0, %v343_v63  ;;  %v3277_v14 = vpack.c.bf16 %v362_v5, %v361_v4  ;;  %v3321_v63 = vpack.c.bf16 %v400_v15, %v399_v54  ;;  %v384_v0 = vld [vmem:[%s5569_s1 + $0xb48] sm:$0xff]  ;;  %v401_v3 = vld [vmem:[%s5569_s1 + $0xbd0] sm:$0xff]  ;;  %v402_v4 = vld [vmem:[%s5569_s1 + $0xbd8] sm:$0xff] }
  0x95   :  { %3228 = vmatpush3.bf16.msra.mxu0 %v3227_v18  ;;  %v377_v18 = vld [vmem:[%s5569_s1 + $0xb10] sm:$0xff]  ;;  %v439_v54 = vld [vmem:[%s5569_s1 + $0xd00] sm:$0xff] }
  0x96   :  { %3230 = vmatprep.subr.bf16.mxu0 %v3229_v20  ;;  %v378_v20 = vld [vmem:[%s5569_s1 + $0xb18] sm:$0xff] }
  0x97   :  { %3260 = vmatpush3.bf16.msra.mxu1 %v3259_v19  ;;  %v3309_v19 = vpack.c.bf16 %v394_v9, %v393_v8  ;;  %v3311_v30 = vpack.c.bf16 %v378_v20, %v377_v18  ;;  %v353_v9 = vld [vmem:[%s5569_s1 + $0xa50] sm:$0xff]  ;;  %v403_v18 = vld [vmem:[%s5569_s1 + $0xbe0] sm:$0xff] }
  0x98   :  { %3262 = vmatprep.subr.bf16.mxu1 %v3261_v25  ;;  %v395_v25 = vld [vmem:[%s5569_s1 + $0xba0] sm:$0xff] }
  0x99   :  { %3232 = vmatpush3.bf16.msra.mxu0 %v3231_v45  ;;  %v347_v45 = vld [vmem:[%s5569_s1 + $0xa20] sm:$0xff]  ;;  %v3313_v35 = vpack.c.bf16 %v396_v26, %v395_v25  ;;  %v356_v25 = vld [vmem:[%s5569_s1 + $0xa68] sm:$0xff] }
  0x9a   :  { %3234 = vmatprep.subr.bf16.mxu0 %v3233_v34  ;;  %v379_v34 = vld [vmem:[%s5569_s1 + $0xb20] sm:$0xff] }
  0x9b   :  { %3264 = vmatpush3.bf16.msra.mxu1 %v3263_v33  ;;  %v348_v33 = vld [vmem:[%s5569_s1 + $0xa28] sm:$0xff]  ;;  %v3315_v42 = vpack.c.bf16 %v380_v36, %v379_v34  ;;  %v387_v26 = vld [vmem:[%s5569_s1 + $0xb60] sm:$0xff] }
  0x9c   :  { %3266 = vmatprep.subr.bf16.mxu1 %v3265_v57  ;;  %v366_v57 = vld [vmem:[%s5569_s1 + $0xab8] sm:$0xff]  ;;  %v3283_v41 = vpack.c.bf16 %v348_v33, %v347_v45  ;;  %v405_v45 = vld [vmem:[%s5569_s1 + $0xbf0] sm:$0xff] }
  0x9d   :  { %3236 = vmatpush3.bf16.msra.mxu0 %v3235_v46  ;;  %v3285_v44 = vpack.c.bf16 %v366_v57, %v365_v37  ;;  %v349_v46 = vld [vmem:[%s5569_s1 + $0xa30] sm:$0xff]  ;;  %v406_v33 = vld [vmem:[%s5569_s1 + $0xbf8] sm:$0xff] }
  0x9e   :  { %3238 = vmatprep.subr.bf16.mxu0 %v3237_v48  ;;  %v381_v48 = vld [vmem:[%s5569_s1 + $0xb30] sm:$0xff]  ;;  %v358_v57 = vld [vmem:[%s5569_s1 + $0xa78] sm:$0xff]  ;;  %v3333_v40 = vpack.c.bf16 %v406_v33, %v405_v45 }
  0x9f   :  { %3268 = vmatpush3.bf16.msra.mxu1 %v3267_v47  ;;  %v350_v47 = vld [vmem:[%s5569_s1 + $0xa38] sm:$0xff]  ;;  %v3319_v56 = vpack.c.bf16 %v382_v50, %v381_v48  ;;  %v357_v37 = vld [vmem:[%s5569_s1 + $0xa70] sm:$0xff] }
  0xa0   :  { %3270 = vmatprep.subr.bf16.mxu1 %v3269_v52  ;;  %v368_v52 = vld [vmem:[%s5569_s1 + $0xac8] sm:$0xff]  ;;  %v3287_v55 = vpack.c.bf16 %v350_v47, %v349_v46  ;;  %v455_v46 = vld [vmem:[%s5569_s1 + $0xd80] sm:$0xff]  ;;  %v3303_v48 = vpack.c.bf16 %v358_v57, %v357_v37 }
  0xa1   :  { %3240 = vmatpush3.bf16.msra.mxu0 %v3239_v60  ;;  %v3289_v59 = vpack.c.bf16 %v368_v52, %v367_v51  ;;  %v351_v60 = vld [vmem:[%s5569_s1 + $0xa40] sm:$0xff]  ;;  %v456_v47 = vld [vmem:[%s5569_s1 + $0xd88] sm:$0xff] }
  0xa2   :  { %3274 = vmatprep.subr.bf16.mxu0 %v3273_v62  ;;  %v383_v62 = vld [vmem:[%s5569_s1 + $0xb40] sm:$0xff]  ;;  %v408_v52 = vld [vmem:[%s5569_s1 + $0xc08] sm:$0xff]  ;;  %v3369_v15 = vpack.c.bf16 %v456_v47, %v455_v46 }
  0xa3   :  { %3272 = vmatpush3.bf16.msra.mxu1 %v3271_v61  ;;  %v352_v61 = vld [vmem:[%s5569_s1 + $0xa48] sm:$0xff]  ;;  %v407_v51 = vld [vmem:[%s5569_s1 + $0xc00] sm:$0xff] }
  0xa4   :  { %3306 = vmatprep.subr.bf16.mxu1 %v3305_v2  ;;  %1429 = vmatmul.mubr.f32.vlgmr.msra.gmra.mrb[8].mxu0 %v684_v7  ;;  %v370_v2 = vld [vmem:[%s5569_s1 + $0xad8] sm:$0xff]  ;;  %v3291_v5 = vpack.c.bf16 %v352_v61, %v351_v60  ;;  %v3323_v7 = vpack.c.bf16 %v384_v0, %v383_v62  ;;  %v700_v60 = vrot.slane %v4491_v22, %v4046_v27  ;;  %v457_v61 = vld [vmem:[%s5569_s1 + $0xd90] sm:$0xff] }
  0xa5   :  { %3276 = vmatpush3.bf16.msra.mxu0 %v3275_v10  ;;  %1568 = vmatprep.mubr.f32.mxu0 %v704_v24  ;;  %v3293_v8 = vpack.c.bf16 %v370_v2, %v369_v1  ;;  %v354_v10 = vld [vmem:[%s5569_s1 + $0xa58] sm:$0xff]  ;;  %v355_v24 = vld [vmem:[%s5569_s1 + $0xa60] sm:$0xff]  ;;  %v3339_v0 = vpack.c.bf16 %v408_v52, %v407_v51  ;;  %v708_v1 = vrot.slane %v4491_v22, %v4055_v31 }
  0xa6   :  { %1499 = vmatmul.mubr.f32.vlgmr.msra.gmra.mrb[8].mxu1 %v692_v12  ;;  %3278 = vmatprep.subr.bf16.mxu0 %v3277_v14  ;;  %v385_v12 = vld [vmem:[%s5569_s1 + $0xb50] sm:$0xff]  ;;  %v386_v14 = vld [vmem:[%s5569_s1 + $0xb58] sm:$0xff]  ;;  %v3295_v20 = vpack.c.bf16 %v354_v10, %v353_v9  ;;  %v3299_v34 = vpack.c.bf16 %v356_v25, %v355_v24  ;;  %v427_v9 = vld [vmem:[%s5569_s1 + $0xca0] sm:$0xff] }
  0xa7   :  { %3308 = vmatpush3.bf16.msra.mxu1 %v3307_v13  ;;  %1638 = vmatprep.mubr.f32.mxu1 %v712_v28  ;;  %v3325_v13 = vpack.c.bf16 %v402_v4, %v401_v3  ;;  %v3327_v21 = vpack.c.bf16 %v386_v14, %v385_v12  ;;  %v458_v62 = vld [vmem:[%s5569_s1 + $0xd98] sm:$0xff]  ;;  %v409_v4 = vld [vmem:[%s5569_s1 + $0xc10] sm:$0xff]  ;;  %v428_v10 = vld [vmem:[%s5569_s1 + $0xca8] sm:$0xff] }
  0xa8   :  { %3310 = vmatprep.subr.bf16.mxu1 %v3309_v19  ;;  %v404_v19 = vld [vmem:[%s5569_s1 + $0xbe8] sm:$0xff]  ;;  %v442_v22 = vld [vmem:[%s5569_s1 + $0xd18] sm:$0xff] }
  0xa9   :  { %3280 = vmatpush3.bf16.msra.mxu0 %v3279_v29  ;;  %v3329_v28 = vpack.c.bf16 %v404_v19, %v403_v18  ;;  %v388_v29 = vld [vmem:[%s5569_s1 + $0xb68] sm:$0xff]  ;;  %v411_v18 = vld [vmem:[%s5569_s1 + $0xc20] sm:$0xff] }
  0xaa   :  { %3282 = vmatprep.subr.bf16.mxu0 %v3281_v32  ;;  %v374_v32 = vld [vmem:[%s5569_s1 + $0xaf8] sm:$0xff]  ;;  %v460_v14 = vld [vmem:[%s5569_s1 + $0xda8] sm:$0xff] }
  0xab   :  { %3312 = vmatpush3.bf16.msra.mxu1 %v3311_v30  ;;  %v373_v30 = vld [vmem:[%s5569_s1 + $0xaf0] sm:$0xff]  ;;  %v444_v24 = vld [vmem:[%s5569_s1 + $0xd28] sm:$0xff] }
  0xac   :  { %3314 = vmatprep.subr.bf16.mxu1 %v3313_v35  ;;  %v3331_v35 = vpack.c.bf16 %v388_v29, %v387_v26  ;;  %v3301_v36 = vpack.c.bf16 %v374_v32, %v373_v30  ;;  %v429_v26 = vld [vmem:[%s5569_s1 + $0xcb0] sm:$0xff] }
  0xad   :  { %3284 = vmatpush3.bf16.msra.mxu0 %v3283_v41  ;;  %v390_v41 = vld [vmem:[%s5569_s1 + $0xb78] sm:$0xff] }
  0xae   :  { %3286 = vmatprep.subr.bf16.mxu0 %v3285_v44  ;;  %v424_v44 = vld [vmem:[%s5569_s1 + $0xc88] sm:$0xff] }
  0xaf   :  { %3316 = vmatpush3.bf16.msra.mxu1 %v3315_v42  ;;  %v423_v42 = vld [vmem:[%s5569_s1 + $0xc80] sm:$0xff] }
  0xb0   :  { %3318 = vmatprep.subr.bf16.mxu1 %v3317_v49  ;;  %v3335_v49 = vpack.c.bf16 %v390_v41, %v389_v38  ;;  %v3337_v50 = vpack.c.bf16 %v424_v44, %v423_v42 }
  0xb1   :  { %3288 = vmatpush3.bf16.msra.mxu0 %v3287_v55  ;;  %v440_v55 = vld [vmem:[%s5569_s1 + $0xd08] sm:$0xff] }
  0xb2   :  { %3290 = vmatprep.subr.bf16.mxu0 %v3289_v59  ;;  %v426_v59 = vld [vmem:[%s5569_s1 + $0xc98] sm:$0xff]  ;;  %v3371_v2 = vpack.c.bf16 %v440_v55, %v439_v54 }
  0xb3   :  { %3320 = vmatpush3.bf16.msra.mxu1 %v3319_v56  ;;  %v425_v56 = vld [vmem:[%s5569_s1 + $0xc90] sm:$0xff] }
  0xb4   :  { %3322 = vmatprep.subr.bf16.mxu1 %v3321_v63  ;;  %v4896_v63 = vld [vmem:[%s5568_s0 + $0x18] sm:$0xff]  ;;  %v3341_v3 = vpack.c.bf16 %v426_v59, %v425_v56 }
  0xb5   :  { %3292 = vmatpush3.bf16.msra.mxu0 %v3291_v5  ;;  %v410_v5 = vld [vmem:[%s5569_s1 + $0xc18] sm:$0xff]  ;;  %v720_v12 = vrot.slane %v4896_v63, %v3762_v6  ;;  %v728_v16 = vrot.slane %v4896_v63, %v3774_v11 }
  0xb6   :  { %3294 = vmatprep.subr.bf16.mxu0 %v3293_v8  ;;  %v3373_v8 = vpack.c.bf16 %v458_v62, %v457_v61  ;;  %v3343_v17 = vpack.c.bf16 %v410_v5, %v409_v4 }
  0xb7   :  { %3324 = vmatpush3.bf16.msra.mxu1 %v3323_v7  ;;  %v441_v7 = vld [vmem:[%s5569_s1 + $0xd10] sm:$0xff] }
  0xb8   :  { %3326 = vmatprep.subr.bf16.mxu1 %v3325_v13  ;;  %v459_v13 = vld [vmem:[%s5569_s1 + $0xda0] sm:$0xff]  ;;  %v3375_v19 = vpack.c.bf16 %v442_v22, %v441_v7 }
  0xb9   :  { %3296 = vmatpush3.bf16.msra.mxu0 %v3295_v20  ;;  %v3345_v20 = vpack.c.bf16 %v428_v10, %v427_v9  ;;  %v3377_v25 = vpack.c.bf16 %v460_v14, %v459_v13 }
  0xba   :  { %3298 = vmatprep.subr.bf16.mxu0 %v3297_v23  ;;  %v443_v23 = vld [vmem:[%s5569_s1 + $0xd20] sm:$0xff] }
  0xbb   :  { %3328 = vmatpush3.bf16.msra.mxu1 %v3327_v21  ;;  %v412_v21 = vld [vmem:[%s5569_s1 + $0xc28] sm:$0xff] }
  0xbc   :  { %3330 = vmatprep.subr.bf16.mxu1 %v3329_v28  ;;  %v430_v28 = vld [vmem:[%s5569_s1 + $0xcb8] sm:$0xff] }
  0xbd   :  { %3300 = vmatpush3.bf16.msra.mxu0 %v3299_v34 }
  0xbe   :  { %3302 = vmatprep.subr.bf16.mxu0 %v3301_v36 }
  0xbf   :  { %3332 = vmatpush3.bf16.msra.mxu1 %v3331_v35 }
  0xc0   :  { %3334 = vmatprep.subr.bf16.mxu1 %v3333_v40 }
  0xc1   :  { %3304 = vmatpush3.bf16.msra.mxu0 %v3303_v48 }
  0xc2   :  { %3338 = vmatprep.subr.bf16.mxu0 %v3337_v50 }
  0xc3   :  { %3336 = vmatpush3.bf16.msra.mxu1 %v3335_v49 }
  0xc4   :  { %3370 = vmatprep.subr.bf16.mxu1 %v3369_v15  ;;  %1569 = vmatmul.mubr.f32.vlgmr.msra.gmra.mrb[10].mxu0 %v700_v60 }
  0xc5   :  { %3340 = vmatpush3.bf16.msra.mxu0 %v3339_v0  ;;  %1708 = vmatprep.mubr.f32.mxu0 %v720_v12 }
  0xc6   :  { %1639 = vmatmul.mubr.f32.vlgmr.msra.gmra.mrb[10].mxu1 %v708_v1  ;;  %3342 = vmatprep.subr.bf16.mxu0 %v3341_v3 }
  0xc7   :  { %3372 = vmatpush3.bf16.msra.mxu1 %v3371_v2 }
  0xc8   :  { %3374 = vmatprep.subr.bf16.mxu1 %v3373_v8 }
  0xc9   :  { %9 = vsyncpa [#allocation3], 0  ;;  %v461_v29 = vld [vmem:[%s5569_s1 + $0xdb0] sm:$0xff]  ;;  %v462_v30 = vld [vmem:[%s5569_s1 + $0xdb8] sm:$0xff]  ;;  %1778 = vmatprep.mubr.f32.mxu1 %v728_v16  ;;  %3344 = vmatpush3.bf16.msra.mxu0 %v3343_v17  ;;  %v3347_v32 = vpack.c.bf16 %v412_v21, %v411_v18  ;;  %v3379_v45 = vpack.c.bf16 %v444_v24, %v443_v23  ;;  %v3349_v33 = vpack.c.bf16 %v430_v28, %v429_v26  ;;  %vm3590_vm0 = vmmov 0   ;;  %s3592_s21 = smov [#allocation2]  }
  0xca   :  { %3346 = vmatprep.subr.bf16.mxu0 %v3345_v20  ;;  %v413_v34 = vld [vmem:[%s5569_s1 + $0xc30] sm:$0xff]  ;;  %v414_v35 = vld [vmem:[%s5569_s1 + $0xc38] sm:$0xff]  ;;  %v3381_v37 = vpack.c.bf16 %v462_v30, %v461_v29  ;;  %v431_v38 = vld [vmem:[%s5569_s1 + $0xcc0] sm:$0xff]  ;;  %vm801_vm1 = vcmask 785408   ;;  %vm2134_vm2 = vcmask 516096   ;;  %vm2163_vm3 = vcmask 523264  }
  0xcb   :  { %3376 = vmatpush3.bf16.msra.mxu1 %v3375_v19  ;;  %v445_v36 = vld [vmem:[%s5569_s1 + $0xd30] sm:$0xff]  ;;  %v446_v57 = vld [vmem:[%s5569_s1 + $0xd38] sm:$0xff]  ;;  %v432_v40 = vld [vmem:[%s5569_s1 + $0xcc8] sm:$0xff]  ;;  %v3351_v44 = vpack.c.bf16 %v414_v35, %v413_v34  ;;  %s2245_s22 = sshll.u32 %s3592_s21, 4  ;;  %vm2237_vm4 = vcmask 0   ;;  %s2246_s22 = int_to_ptr.vmem [resolvable:$true] %s2245_s22 }
  0xcc   :  { %3378 = vmatprep.subr.bf16.mxu1 %v3377_v25  ;;  %v463_v41 = vld [vmem:[%s5569_s1 + $0xdc0] sm:$0xff]  ;;  %v464_v42 = vld [vmem:[%s5569_s1 + $0xdc8] sm:$0xff]  ;;  %v3383_v46 = vpack.c.bf16 %v446_v57, %v445_v36  ;;  %v3353_v47 = vpack.c.bf16 %v432_v40, %v431_v38  ;;  %v433_v54 = vld [vmem:[%s5569_s1 + $0xcd0] sm:$0xff]  ;;  %s3565_s23 = scalar_lea.vmem %s2246_s22, 16  ;;  %s3569_s24 = scalar_lea.vmem %s2246_s22, 32 }
  0xcd   :  { %3348 = vmatpush3.bf16.msra.mxu0 %v3347_v32  ;;  %v415_v48 = vld [vmem:[%s5569_s1 + $0xc40] sm:$0xff]  ;;  %v416_v49 = vld [vmem:[%s5569_s1 + $0xc48] sm:$0xff]  ;;  %v3385_v51 = vpack.c.bf16 %v464_v42, %v463_v41  ;;  %v434_v15 = vld [vmem:[%s5569_s1 + $0xcd8] sm:$0xff]  ;;  %p3566_p0 = scmp.ne.s32.totalorder %s2246_s22, %s3565_s23  ;;  %p3570_p1 = scmp.lt.s32.totalorder %s2246_s22, %s2246_s22 }
  0xce   :  { %3350 = vmatprep.subr.bf16.mxu0 %v3349_v33  ;;  %v447_v50 = vld [vmem:[%s5569_s1 + $0xd40] sm:$0xff]  ;;  %v448_v52 = vld [vmem:[%s5569_s1 + $0xd48] sm:$0xff]  ;;  %v465_v55 = vld [vmem:[%s5569_s1 + $0xdd0] sm:$0xff]  ;;  %v3355_v59 = vpack.c.bf16 %v416_v49, %v415_v48  ;;  %v3357_v61 = vpack.c.bf16 %v434_v15, %v433_v54  ;;  %v716_v48 = vrot.slane %v4896_v63, %v3834_v39  ;;  %p3571_p2 = scmp.lt.s32.totalorder %s3569_s24, %s3565_s23 }
  0xcf   :  { %3380 = vmatpush3.bf16.msra.mxu1 %v3379_v45  ;;  %v466_v56 = vld [vmem:[%s5569_s1 + $0xdd8] sm:$0xff]  ;;  %v3387_v60 = vpack.c.bf16 %v448_v52, %v447_v50  ;;  %v417_v62 = vld [vmem:[%s5569_s1 + $0xc50] sm:$0xff]  ;;  %v435_v4 = vld [vmem:[%s5569_s1 + $0xce0] sm:$0xff]  ;;  %v724_v52 = vrot.slane %v4896_v63, %v3843_v43 }
  0xd0   :  { %3382 = vmatprep.subr.bf16.mxu1 %v3381_v37  ;;  %v418_v0 = vld [vmem:[%s5569_s1 + $0xc58] sm:$0xff]  ;;  %v449_v1 = vld [vmem:[%s5569_s1 + $0xd50] sm:$0xff]  ;;  %v3389_v2 = vpack.c.bf16 %v466_v56, %v465_v55  ;;  %v436_v5 = vld [vmem:[%s5569_s1 + $0xce8] sm:$0xff]  ;;  %p3572_p3 = por %p3571_p2, %p3570_p1 }
  0xd1   :  { %3352 = vmatpush3.bf16.msra.mxu0 %v3351_v44  ;;  %v450_v3 = vld [vmem:[%s5569_s1 + $0xd58] sm:$0xff]  ;;  %v467_v7 = vld [vmem:[%s5569_s1 + $0xde0] sm:$0xff]  ;;  %v468_v8 = vld [vmem:[%s5569_s1 + $0xde8] sm:$0xff]  ;;  %v3359_v22 = vpack.c.bf16 %v418_v0, %v417_v62  ;;  %v3361_v10 = vpack.c.bf16 %v436_v5, %v435_v4  ;;  %v744_v4 = vrot.slane %v4896_v63, %v3875_v58 }
  0xd2   :  { %3354 = vmatprep.subr.bf16.mxu0 %v3353_v47  ;;  %v3391_v9 = vpack.c.bf16 %v450_v3, %v449_v1  ;;  %v419_v12 = vld [vmem:[%s5569_s1 + $0xc60] sm:$0xff]  ;;  %v420_v13 = vld [vmem:[%s5569_s1 + $0xc68] sm:$0xff]  ;;  %v3393_v16 = vpack.c.bf16 %v468_v8, %v467_v7  ;;  %v437_v18 = vld [vmem:[%s5569_s1 + $0xcf0] sm:$0xff]  ;;  %v736_v1 = vrot.slane %v4896_v63, %v3864_v53  ;;  %p3573_p4 = pnand %p3572_p3, %p3566_p0 }
  0xd3   :  { %3384 = vmatpush3.bf16.msra.mxu1 %v3383_v46  ;;  %v451_v14 = vld [vmem:[%s5569_s1 + $0xd60] sm:$0xff]  ;;  %v452_v17 = vld [vmem:[%s5569_s1 + $0xd68] sm:$0xff]  ;;  %v438_v19 = vld [vmem:[%s5569_s1 + $0xcf8] sm:$0xff]  ;;  %v3363_v23 = vpack.c.bf16 %v420_v13, %v419_v12 }
  0xd4   :  { %3386 = vmatprep.subr.bf16.mxu1 %v3385_v51  ;;  %v469_v20 = vld [vmem:[%s5569_s1 + $0xdf0] sm:$0xff]  ;;  %v470_v21 = vld [vmem:[%s5569_s1 + $0xdf8] sm:$0xff]  ;;  %v3395_v24 = vpack.c.bf16 %v452_v17, %v451_v14  ;;  %v3365_v25 = vpack.c.bf16 %v438_v19, %v437_v18  ;;  %v487_v45 = vld [vmem:[%s5569_s1 + $0xe80] sm:$0xff] }
  0xd5   :  { %3356 = vmatpush3.bf16.msra.mxu0 %v3355_v59  ;;  %v421_v26 = vld [vmem:[%s5569_s1 + $0xc70] sm:$0xff]  ;;  %v422_v28 = vld [vmem:[%s5569_s1 + $0xc78] sm:$0xff]  ;;  %v3397_v30 = vpack.c.bf16 %v470_v21, %v469_v20  ;;  %v488_v33 = vld [vmem:[%s5569_s1 + $0xe88] sm:$0xff] }
  0xd6   :  { %3358 = vmatprep.subr.bf16.mxu0 %v3357_v61  ;;  %v453_v29 = vld [vmem:[%s5569_s1 + $0xd70] sm:$0xff]  ;;  %v454_v32 = vld [vmem:[%s5569_s1 + $0xd78] sm:$0xff]  ;;  %v519_v34 = vld [vmem:[%s5569_s1 + $0xf80] sm:$0xff]  ;;  %v3367_v36 = vpack.c.bf16 %v422_v28, %v421_v26  ;;  %v3401_v57 = vpack.c.bf16 %v488_v33, %v487_v45 }
  0xd7   :  { %3388 = vmatpush3.bf16.msra.mxu1 %v3387_v60  ;;  %v520_v35 = vld [vmem:[%s5569_s1 + $0xf88] sm:$0xff]  ;;  %v3399_v37 = vpack.c.bf16 %v454_v32, %v453_v29  ;;  %v471_v38 = vld [vmem:[%s5569_s1 + $0xe00] sm:$0xff]  ;;  %v489_v46 = vld [vmem:[%s5569_s1 + $0xe90] sm:$0xff] }
  0xd8   :  { %3390 = vmatprep.subr.bf16.mxu1 %v3389_v2  ;;  %v472_v40 = vld [vmem:[%s5569_s1 + $0xe08] sm:$0xff]  ;;  %v503_v41 = vld [vmem:[%s5569_s1 + $0xf00] sm:$0xff]  ;;  %v3433_v42 = vpack.c.bf16 %v520_v35, %v519_v34  ;;  %v490_v47 = vld [vmem:[%s5569_s1 + $0xe98] sm:$0xff] }
  0xd9   :  { %3360 = vmatpush3.bf16.msra.mxu0 %v3359_v22  ;;  %v504_v44 = vld [vmem:[%s5569_s1 + $0xf08] sm:$0xff]  ;;  %v521_v49 = vld [vmem:[%s5569_s1 + $0xf90] sm:$0xff]  ;;  %v522_v50 = vld [vmem:[%s5569_s1 + $0xf98] sm:$0xff]  ;;  %v3403_v51 = vpack.c.bf16 %v472_v40, %v471_v38  ;;  %v3405_v15 = vpack.c.bf16 %v490_v47, %v489_v46 }
  0xda   :  { %3362 = vmatprep.subr.bf16.mxu0 %v3361_v10  ;;  %v3435_v54 = vpack.c.bf16 %v504_v44, %v503_v41  ;;  %v473_v55 = vld [vmem:[%s5569_s1 + $0xe10] sm:$0xff]  ;;  %v474_v56 = vld [vmem:[%s5569_s1 + $0xe18] sm:$0xff]  ;;  %v3437_v60 = vpack.c.bf16 %v522_v50, %v521_v49  ;;  %v491_v62 = vld [vmem:[%s5569_s1 + $0xea0] sm:$0xff] }
  0xdb   :  { %3392 = vmatpush3.bf16.msra.mxu1 %v3391_v9  ;;  %v505_v59 = vld [vmem:[%s5569_s1 + $0xf10] sm:$0xff]  ;;  %v506_v61 = vld [vmem:[%s5569_s1 + $0xf18] sm:$0xff]  ;;  %v492_v0 = vld [vmem:[%s5569_s1 + $0xea8] sm:$0xff]  ;;  %v3407_v5 = vpack.c.bf16 %v474_v56, %v473_v55 }
  0xdc   :  { %3394 = vmatprep.subr.bf16.mxu1 %v3393_v16  ;;  %v523_v2 = vld [vmem:[%s5569_s1 + $0xfa0] sm:$0xff]  ;;  %v524_v3 = vld [vmem:[%s5569_s1 + $0xfa8] sm:$0xff]  ;;  %v3439_v7 = vpack.c.bf16 %v506_v61, %v505_v59  ;;  %v3409_v8 = vpack.c.bf16 %v492_v0, %v491_v62  ;;  %v493_v12 = vld [vmem:[%s5569_s1 + $0xeb0] sm:$0xff] }
  0xdd   :  { %3364 = vmatpush3.bf16.msra.mxu0 %v3363_v23  ;;  %v475_v53 = vld [vmem:[%s5569_s1 + $0xe20] sm:$0xff]  ;;  %v476_v22 = vld [vmem:[%s5569_s1 + $0xe28] sm:$0xff]  ;;  %v3441_v58 = vpack.c.bf16 %v524_v3, %v523_v2  ;;  %v494_v13 = vld [vmem:[%s5569_s1 + $0xeb8] sm:$0xff] }
  0xde   :  { %3366 = vmatprep.subr.bf16.mxu0 %v3365_v25  ;;  %v507_v9 = vld [vmem:[%s5569_s1 + $0xf20] sm:$0xff]  ;;  %v508_v10 = vld [vmem:[%s5569_s1 + $0xf28] sm:$0xff]  ;;  %v525_v14 = vld [vmem:[%s5569_s1 + $0xfb0] sm:$0xff]  ;;  %v3411_v17 = vpack.c.bf16 %v476_v22, %v475_v53  ;;  %v3413_v19 = vpack.c.bf16 %v494_v13, %v493_v12 }
  0xdf   :  { %3396 = vmatpush3.bf16.msra.mxu1 %v3395_v24  ;;  %v526_v16 = vld [vmem:[%s5569_s1 + $0xfb8] sm:$0xff]  ;;  %v3443_v18 = vpack.c.bf16 %v508_v10, %v507_v9  ;;  %v477_v20 = vld [vmem:[%s5569_s1 + $0xe30] sm:$0xff]  ;;  %v495_v26 = vld [vmem:[%s5569_s1 + $0xec0] sm:$0xff] }
  0xe0   :  { %3398 = vmatprep.subr.bf16.mxu1 %v3397_v30  ;;  %v478_v21 = vld [vmem:[%s5569_s1 + $0xe38] sm:$0xff]  ;;  %v509_v23 = vld [vmem:[%s5569_s1 + $0xf30] sm:$0xff]  ;;  %v3445_v24 = vpack.c.bf16 %v526_v16, %v525_v14  ;;  %v496_v28 = vld [vmem:[%s5569_s1 + $0xec8] sm:$0xff] }
  0xe1   :  { %3368 = vmatpush3.bf16.msra.mxu0 %v3367_v36  ;;  %v510_v25 = vld [vmem:[%s5569_s1 + $0xf38] sm:$0xff]  ;;  %v527_v29 = vld [vmem:[%s5569_s1 + $0xfc0] sm:$0xff]  ;;  %v528_v30 = vld [vmem:[%s5569_s1 + $0xfc8] sm:$0xff]  ;;  %v3415_v32 = vpack.c.bf16 %v478_v21, %v477_v20  ;;  %v3417_v33 = vpack.c.bf16 %v496_v28, %v495_v26 }
  0xe2   :  { %3402 = vmatprep.subr.bf16.mxu0 %v3401_v57  ;;  %v3447_v45 = vpack.c.bf16 %v510_v25, %v509_v23  ;;  %v479_v34 = vld [vmem:[%s5569_s1 + $0xe40] sm:$0xff]  ;;  %v480_v35 = vld [vmem:[%s5569_s1 + $0xe48] sm:$0xff]  ;;  %v497_v38 = vld [vmem:[%s5569_s1 + $0xed0] sm:$0xff] }
  0xe3   :  { %3400 = vmatpush3.bf16.msra.mxu1 %v3399_v37  ;;  %v511_v36 = vld [vmem:[%s5569_s1 + $0xf40] sm:$0xff]  ;;  %v3449_v37 = vpack.c.bf16 %v528_v30, %v527_v29  ;;  %v512_v57 = vld [vmem:[%s5569_s1 + $0xf48] sm:$0xff]  ;;  %v498_v40 = vld [vmem:[%s5569_s1 + $0xed8] sm:$0xff]  ;;  %v3419_v44 = vpack.c.bf16 %v480_v35, %v479_v34 }
  0xe4   :  { %3434 = vmatprep.subr.bf16.mxu1 %v3433_v42  ;;  %1709 = vmatmul.mubr.f32.vlgmr.msra.gmra.mrb[12].mxu0 %v716_v48  ;;  %v529_v41 = vld [vmem:[%s5569_s1 + $0xfd0] sm:$0xff]  ;;  %v530_v42 = vld [vmem:[%s5569_s1 + $0xfd8] sm:$0xff]  ;;  %v3451_v46 = vpack.c.bf16 %v512_v57, %v511_v36  ;;  %v3421_v47 = vpack.c.bf16 %v498_v40, %v497_v38  ;;  %v531_v55 = vld [vmem:[%s5569_s1 + $0xfe0] sm:$0xff] }
  0xe5   :  { %3404 = vmatpush3.bf16.msra.mxu0 %v3403_v51  ;;  %1848 = vmatprep.mubr.f32.mxu0 %v736_v1  ;;  %v481_v48 = vld [vmem:[%s5569_s1 + $0xe50] sm:$0xff]  ;;  %v482_v49 = vld [vmem:[%s5569_s1 + $0xe58] sm:$0xff]  ;;  %v3453_v51 = vpack.c.bf16 %v530_v42, %v529_v41  ;;  %v532_v56 = vld [vmem:[%s5569_s1 + $0xfe8] sm:$0xff]  ;;  %v732_v41 = vrot.slane %v4896_v63, %v4046_v27 }
  0xe6   :  { %1779 = vmatmul.mubr.f32.vlgmr.msra.gmra.mrb[12].mxu1 %v724_v52  ;;  %3406 = vmatprep.subr.bf16.mxu0 %v3405_v15  ;;  %v513_v50 = vld [vmem:[%s5569_s1 + $0xf50] sm:$0xff]  ;;  %v514_v52 = vld [vmem:[%s5569_s1 + $0xf58] sm:$0xff]  ;;  %v500_v15 = vld [vmem:[%s5569_s1 + $0xee8] sm:$0xff]  ;;  %v3423_v59 = vpack.c.bf16 %v482_v49, %v481_v48  ;;  %v3457_v3 = vpack.c.bf16 %v532_v56, %v531_v55  ;;  %v740_v48 = vrot.slane %v4896_v63, %v4055_v31 }
  0xe7   :  { %3436 = vmatpush3.bf16.msra.mxu1 %v3435_v54  ;;  %1918 = vmatprep.mubr.f32.mxu1 %v744_v4  ;;  %v499_v54 = vld [vmem:[%s5569_s1 + $0xee0] sm:$0xff]  ;;  %v484_v0 = vld [vmem:[%s5569_s1 + $0xe68] sm:$0xff]  ;;  %v533_v9 = vld [vmem:[%s5569_s1 + $0xff0] sm:$0xff] }
  0xe8   :  { %3438 = vmatprep.subr.bf16.mxu1 %v3437_v60  ;;  %v3455_v60 = vpack.c.bf16 %v514_v52, %v513_v50  ;;  %v3425_v61 = vpack.c.bf16 %v500_v15, %v499_v54  ;;  %v483_v62 = vld [vmem:[%s5569_s1 + $0xe60] sm:$0xff]  ;;  %v516_v4 = vld [vmem:[%s5569_s1 + $0xf68] sm:$0xff]  ;;  %v517_v20 = vld [vmem:[%s5569_s1 + $0xf70] sm:$0xff] }
  0xe9   :  { %3408 = vmatpush3.bf16.msra.mxu0 %v3407_v5  ;;  %v515_v1 = vld [vmem:[%s5569_s1 + $0xf60] sm:$0xff]  ;;  %v501_v5 = vld [vmem:[%s5569_s1 + $0xef0] sm:$0xff]  ;;  %v3427_v13 = vpack.c.bf16 %v484_v0, %v483_v62  ;;  %v552_v26 = vld [vmem:[%s5569_s1 + $0x1088] sm:$0xff] }
  0xea   :  { %3410 = vmatprep.subr.bf16.mxu0 %v3409_v8  ;;  %v611_v8 = vld [vmem:[%s5570_s2] sm:$0x1]  ;;  %v3459_v16 = vpack.c.bf16 %v516_v4, %v515_v1  ;;  %v584_v29 = vld [vmem:[%s5569_s1 + $0x1188] sm:$0xff]  ;;  %v553_v38 = vld [vmem:[%s5569_s1 + $0x1090] sm:$0xff] }
  0xeb   :  { %3440 = vmatpush3.bf16.msra.mxu1 %v3439_v7  ;;  %v502_v7 = vld [vmem:[%s5569_s1 + $0xef8] sm:$0xff]  ;;  %v551_v25 = vld [vmem:[%s5569_s1 + $0x1080] sm:$0xff]  ;;  %v536_v35 = vld [vmem:[%s5569_s1 + $0x1008] sm:$0xff] }
  0xec   :  { %3442 = vmatprep.subr.bf16.mxu1 %v3441_v58  ;;  %v534_v58 = vld [vmem:[%s5569_s1 + $0xff8] sm:$0xff]  ;;  %v583_v28 = vld [vmem:[%s5569_s1 + $0x1180] sm:$0xff]  ;;  %v568_v57 = vld [vmem:[%s5569_s1 + $0x1108] sm:$0xff] }
  0xed   :  { %3412 = vmatpush3.bf16.msra.mxu0 %v3411_v17  ;;  %v3429_v17 = vpack.c.bf16 %v502_v7, %v501_v5  ;;  %v3461_v23 = vpack.c.bf16 %v534_v58, %v533_v9  ;;  %v535_v34 = vld [vmem:[%s5569_s1 + $0x1000] sm:$0xff]  ;;  %v554_v40 = vld [vmem:[%s5569_s1 + $0x1098] sm:$0xff]  ;;  %v585_v42 = vld [vmem:[%s5569_s1 + $0x1190] sm:$0xff] }
  0xee   :  { %3414 = vmatprep.subr.bf16.mxu0 %v3413_v19  ;;  %v486_v19 = vld [vmem:[%s5569_s1 + $0xe78] sm:$0xff]  ;;  %v567_v36 = vld [vmem:[%s5569_s1 + $0x1100] sm:$0xff]  ;;  %v3469_v50 = vpack.c.bf16 %v554_v40, %v553_v38  ;;  %v569_v54 = vld [vmem:[%s5569_s1 + $0x1110] sm:$0xff] }
  0xef   :  { %3444 = vmatpush3.bf16.msra.mxu1 %v3443_v18  ;;  %v485_v18 = vld [vmem:[%s5569_s1 + $0xe70] sm:$0xff]  ;;  %v3499_v49 = vpack.c.bf16 %v568_v57, %v567_v36  ;;  %v538_v52 = vld [vmem:[%s5569_s1 + $0x1018] sm:$0xff]  ;;  %v555_v63 = vld [vmem:[%s5569_s1 + $0x10a0] sm:$0xff] }
  0xf0   :  { %3446 = vmatprep.subr.bf16.mxu1 %v3445_v24  ;;  %v518_v24 = vld [vmem:[%s5569_s1 + $0xf78] sm:$0xff]  ;;  %v556_v55 = vld [vmem:[%s5569_s1 + $0x10a8] sm:$0xff]  ;;  %v557_v5 = vld [vmem:[%s5569_s1 + $0x10b0] sm:$0xff] }
  0xf1   :  { %3416 = vmatpush3.bf16.msra.mxu0 %v3415_v32  ;;  %v3431_v32 = vpack.c.bf16 %v486_v19, %v485_v18  ;;  %v570_v31 = vld [vmem:[%s5569_s1 + $0x1118] sm:$0xff]  ;;  %v3473_v1 = vpack.c.bf16 %v556_v55, %v555_v63  ;;  %v572_v4 = vld [vmem:[%s5569_s1 + $0x1128] sm:$0xff]  ;;  %v591_v19 = vld [vmem:[%s5569_s1 + $0x11c0] sm:$0xff] }
  0xf2   :  { %3418 = vmatprep.subr.bf16.mxu0 %v3417_v33  ;;  %v3465_v33 = vpack.c.bf16 %v552_v26, %v551_v25  ;;  %v3503_v0 = vpack.c.bf16 %v570_v31, %v569_v54  ;;  %v558_v7 = vld [vmem:[%s5569_s1 + $0x10b8] sm:$0xff]  ;;  %v560_v18 = vld [vmem:[%s5569_s1 + $0x10c8] sm:$0xff]  ;;  %v543_v25 = vld [vmem:[%s5569_s1 + $0x1040] sm:$0xff] }
  0xf3   :  { %3448 = vmatpush3.bf16.msra.mxu1 %v3447_v45  ;;  %v3463_v45 = vpack.c.bf16 %v518_v24, %v517_v20  ;;  %v3477_v58 = vpack.c.bf16 %v558_v7, %v557_v5  ;;  %v592_v20 = vld [vmem:[%s5569_s1 + $0x11c8] sm:$0xff]  ;;  %v545_v38 = vld [vmem:[%s5569_s1 + $0x1050] sm:$0xff]  ;;  %v546_v40 = vld [vmem:[%s5569_s1 + $0x1058] sm:$0xff] }
  0xf4   :  { %3450 = vmatprep.subr.bf16.mxu1 %v3449_v37  ;;  %v3497_v37 = vpack.c.bf16 %v584_v29, %v583_v28  ;;  %v544_v26 = vld [vmem:[%s5569_s1 + $0x1048] sm:$0xff]  ;;  %v575_v28 = vld [vmem:[%s5569_s1 + $0x1140] sm:$0xff]  ;;  %v3513_v29 = vpack.c.bf16 %v592_v20, %v591_v19  ;;  %v3589_v20 = vmov 0.0|0.0  }
  0xf5   :  { %3420 = vmatpush3.bf16.msra.mxu0 %v3419_v44  ;;  %v586_v44 = vld [vmem:[%s5569_s1 + $0x1198] sm:$0xff]  ;;  %v3483_v36 = vpack.c.bf16 %v544_v26, %v543_v25  ;;  %v548_v31 = vld [vmem:[%s5569_s1 + $0x1068] sm:$0xff]  ;;  %v579_v63 = vld [vmem:[%s5569_s1 + $0x1160] sm:$0xff]  ;;  %v3591_v25 = vmov 0.0  }
  0xf6   :  { %3422 = vmatprep.subr.bf16.mxu0 %v3421_v47  ;;  %v3467_v47 = vpack.c.bf16 %v536_v35, %v535_v34  ;;  %v3501_v15 = vpack.c.bf16 %v586_v44, %v585_v42  ;;  %v593_v34 = vld [vmem:[%s5569_s1 + $0x11d0] sm:$0xff]  ;;  %v594_v35 = vld [vmem:[%s5569_s1 + $0x11d8] sm:$0xff] }
  0xf7   :  { %3452 = vmatpush3.bf16.msra.mxu1 %v3451_v46  ;;  %v2287_v2 = vpop.f32.mrb[0].mxu0  ;;  %v5306_v46 = vld [vmem:[%s5568_s0 + $0x20] sm:$0x1f]  ;;  %v3517_v42 = vpack.c.bf16 %v594_v35, %v593_v34  ;;  %v578_v44 = vld [vmem:[%s5569_s1 + $0x1158] sm:$0xff]  ;;  %v609_v35 = vld [vmem:[%s5569_s1 + $0x1250] sm:$0xff] }
  0xf8   :  { %3454 = vmatprep.subr.bf16.mxu1 %v3453_v51  ;;  %v2288_v53 = vpop.f32.mrb[1].mxu0  ;;  %v537_v51 = vld [vmem:[%s5569_s1 + $0x1010] sm:$0xff]  ;;  %v752_v56 = vrot.slane %v5306_v46, %v3762_v6  ;;  %v539_v6 = vld [vmem:[%s5569_s1 + $0x1020] sm:$0xff]  ;;  %v756_v19 = vrot.slane %v5306_v46, %v3843_v43 }
  0xf9   :  { %v2322_v22 = vpop.f32.mrb[0].mxu1  ;;  %v2289_v10 = vadd.f32 %v2288_v53, %v2287_v2  ;;  %3424 = vmatpush3.bf16.msra.mxu0 %v3423_v59  ;;  %v587_v59 = vld [vmem:[%s5569_s1 + $0x11a0] sm:$0xff]  ;;  %v3471_v62 = vpack.c.bf16 %v538_v52, %v537_v51  ;;  %v540_v2 = vld [vmem:[%s5569_s1 + $0x1028] sm:$0xff]  ;;  %v590_v53 = vld [vmem:[%s5569_s1 + $0x11b8] sm:$0xff]  ;;  %v3487_v51 = vpack.c.bf16 %v546_v40, %v545_v38 }
  0xfa   :  { %v2323_v12 = vpop.f32.mrb[1].mxu1  ;;  %3426 = vmatprep.subr.bf16.mxu0 %v3425_v61  ;;  %v760_v61 = vrot.slane %v5306_v46, %v3774_v11  ;;  %v603_v43 = vld [vmem:[%s5569_s1 + $0x1220] sm:$0xff] }
  0xfb   :  { %v2324_v14 = vadd.f32 %v2323_v12, %v2322_v22  ;;  %3456 = vmatpush3.bf16.msra.mxu1 %v3455_v60  ;;  %v871_v21 = vadd.f32 %v2289_v10, %v611_v8  ;;  %v588_v60 = vld [vmem:[%s5569_s1 + $0x11a8] sm:$0xff]  ;;  %v589_v8 = vld [vmem:[%s5569_s1 + $0x11b0] sm:$0xff]  ;;  %v3475_v22 = vpack.c.bf16 %v540_v2, %v539_v6  ;;  %v542_v12 = vld [vmem:[%s5569_s1 + $0x1038] sm:$0xff] }
  0xfc   :  { %3458 = vmatprep.subr.bf16.mxu1 %v3457_v3  ;;  %v571_v3 = vld [vmem:[%s5569_s1 + $0x1120] sm:$0xff]  ;;  %v3505_v11 = vpack.c.bf16 %v588_v60, %v587_v59  ;;  %v541_v10 = vld [vmem:[%s5569_s1 + $0x1030] sm:$0xff]  ;;  %v580_v59 = vld [vmem:[%s5569_s1 + $0x1168] sm:$0xff] }
  0xfd   :  { %v5275_v30 = vadd.f32 %v2324_v14, %v871_v21  ;;  %3428 = vmatpush3.bf16.msra.mxu0 %v3427_v13  ;;  %v3507_v9 = vpack.c.bf16 %v572_v4, %v571_v3  ;;  %v573_v13 = vld [vmem:[%s5569_s1 + $0x1130] sm:$0xff]  ;;  %v3509_v14 = vpack.c.bf16 %v590_v53, %v589_v8  ;;  %v3479_v21 = vpack.c.bf16 %v542_v12, %v541_v10  ;;  %v598_v6 = vld [vmem:[%s5569_s1 + $0x11f8] sm:$0xff] }
  0xfe   :  { %3430 = vmatprep.subr.bf16.mxu0 %v3429_v17  ;;  %v559_v17 = vld [vmem:[%s5569_s1 + $0x10c0] sm:$0xff]  ;;  %v565_v60 = vld [vmem:[%s5569_s1 + $0x10f0] sm:$0xff]  ;;  %v3523_v5 = vpack.c.bf16 %v580_v59, %v579_v63  ;;  %v550_v53 = vld [vmem:[%s5569_s1 + $0x1078] sm:$0xff] }
  0xff   :  { %3460 = vmatpush3.bf16.msra.mxu1 %v3459_v16  ;;  %v574_v16 = vld [vmem:[%s5569_s1 + $0x1138] sm:$0xff]  ;;  %v3481_v24 = vpack.c.bf16 %v560_v18, %v559_v17  ;;  %v549_v8 = vld [vmem:[%s5569_s1 + $0x1070] sm:$0xff]  ;;  %v748_v17 = vrot.slane %v5306_v46, %v3834_v39 }
 0x100   :  { %3462 = vmatprep.subr.bf16.mxu1 %v3461_v23  ;;  %v3511_v23 = vpack.c.bf16 %v574_v16, %v573_v13  ;;  %v582_v10 = vld [vmem:[%s5569_s1 + $0x1178] sm:$0xff]  ;;  %v3495_v13 = vpack.c.bf16 %v550_v53, %v549_v8  ;;  %v600_v16 = vld [vmem:[%s5569_s1 + $0x1208] sm:$0xff] }
 0x101   :  { %3432 = vmatpush3.bf16.msra.mxu0 %v3431_v32  ;;  %v576_v32 = vld [vmem:[%s5569_s1 + $0x1148] sm:$0xff] }
 0x102   :  { %3466 = vmatprep.subr.bf16.mxu0 %v3465_v33  ;;  %v562_v33 = vld [vmem:[%s5569_s1 + $0x10d8] sm:$0xff] }
 0x103   :  { %3464 = vmatpush3.bf16.msra.mxu1 %v3463_v45  ;;  %v561_v45 = vld [vmem:[%s5569_s1 + $0x10d0] sm:$0xff] }
 0x104   :  { %3498 = vmatprep.subr.bf16.mxu1 %v3497_v37  ;;  %1849 = vmatmul.mubr.f32.vlgmr.msra.gmra.mrb[14].mxu0 %v732_v41  ;;  %v3515_v37 = vpack.c.bf16 %v576_v32, %v575_v28  ;;  %v3485_v57 = vpack.c.bf16 %v562_v33, %v561_v45  ;;  %v577_v41 = vld [vmem:[%s5569_s1 + $0x1150] sm:$0xff]  ;;  %v607_v45 = vld [vmem:[%s5569_s1 + $0x1240] sm:$0xff]  ;;  %v608_v33 = vld [vmem:[%s5569_s1 + $0x1248] sm:$0xff] }
 0x105   :  { %3468 = vmatpush3.bf16.msra.mxu0 %v3467_v47  ;;  %1988 = vmatprep.mubr.f32.mxu0 %v752_v56  ;;  %v563_v47 = vld [vmem:[%s5569_s1 + $0x10e0] sm:$0xff]  ;;  %v3519_v52 = vpack.c.bf16 %v578_v44, %v577_v41  ;;  %v605_v28 = vld [vmem:[%s5569_s1 + $0x1230] sm:$0xff]  ;;  %v3542_v34 = vpack.c.bf16 %v608_v33, %v607_v45  ;;  %v764_v41 = vrot.slane %v5306_v46, %v4046_v27 }
 0x106   :  { %1919 = vmatmul.mubr.f32.vlgmr.msra.gmra.mrb[14].mxu1 %v740_v48  ;;  %3470 = vmatprep.subr.bf16.mxu0 %v3469_v50  ;;  %v564_v48 = vld [vmem:[%s5569_s1 + $0x10e8] sm:$0xff] }
 0x107   :  { %3500 = vmatpush3.bf16.msra.mxu1 %v3499_v49  ;;  %2058 = vmatprep.mubr.f32.mxu1 %v760_v61  ;;  %v595_v49 = vld [vmem:[%s5569_s1 + $0x11e0] sm:$0xff]  ;;  %v596_v50 = vld [vmem:[%s5569_s1 + $0x11e8] sm:$0xff]  ;;  %v3489_v54 = vpack.c.bf16 %v564_v48, %v563_v47  ;;  %v566_v61 = vld [vmem:[%s5569_s1 + $0x10f8] sm:$0xff] }
 0x108   :  { %3502 = vmatprep.subr.bf16.mxu1 %v3501_v15  ;;  %v547_v15 = vld [vmem:[%s5569_s1 + $0x1060] sm:$0xff]  ;;  %v3521_v56 = vpack.c.bf16 %v596_v50, %v595_v49  ;;  %v3493_v7 = vpack.c.bf16 %v566_v61, %v565_v60 }
 0x109   :  { %3472 = vmatpush3.bf16.msra.mxu0 %v3471_v62 }
 0x10a   :  { %3474 = vmatprep.subr.bf16.mxu0 %v3473_v1  ;;  %v597_v1 = vld [vmem:[%s5569_s1 + $0x11f0] sm:$0xff] }
 0x10b   :  { %3504 = vmatpush3.bf16.msra.mxu1 %v3503_v0 }
 0x10c   :  { %3506 = vmatprep.subr.bf16.mxu1 %v3505_v11  ;;  %v3491_v11 = vpack.c.bf16 %v548_v31, %v547_v15 }
 0x10d   :  { %3476 = vmatpush3.bf16.msra.mxu0 %v3475_v22 }
 0x10e   :  { %3478 = vmatprep.subr.bf16.mxu0 %v3477_v58  ;;  %v581_v58 = vld [vmem:[%s5569_s1 + $0x1170] sm:$0xff] }
 0x10f   :  { %3508 = vmatpush3.bf16.msra.mxu1 %v3507_v9  ;;  %v3525_v9 = vpack.c.bf16 %v598_v6, %v597_v1 }
 0x110   :  { %3510 = vmatprep.subr.bf16.mxu1 %v3509_v14  ;;  %v3527_v14 = vpack.c.bf16 %v582_v10, %v581_v58 }
 0x111   :  { %3480 = vmatpush3.bf16.msra.mxu0 %v3479_v21  ;;  %v601_v21 = vld [vmem:[%s5569_s1 + $0x1210] sm:$0xff] }
 0x112   :  { %3482 = vmatprep.subr.bf16.mxu0 %v3481_v24  ;;  %v604_v24 = vld [vmem:[%s5569_s1 + $0x1228] sm:$0xff] }
 0x113   :  { %3512 = vmatpush3.bf16.msra.mxu1 %v3511_v23  ;;  %v602_v23 = vld [vmem:[%s5569_s1 + $0x1218] sm:$0xff]  ;;  %v3536_v26 = vpack.c.bf16 %v604_v24, %v603_v43 }
 0x114   :  { %3514 = vmatprep.subr.bf16.mxu1 %v3513_v29  ;;  %v3533_v39 = vpack.c.bf16 %v602_v23, %v601_v21  ;;  %v606_v29 = vld [vmem:[%s5569_s1 + $0x1238] sm:$0xff] }
 0x115   :  { %3484 = vmatpush3.bf16.msra.mxu0 %v3483_v36  ;;  %v3539_v32 = vpack.c.bf16 %v606_v29, %v605_v28  ;;  %v610_v36 = vld [vmem:[%s5569_s1 + $0x1258] sm:$0xff] }
 0x116   :  { %3486 = vmatprep.subr.bf16.mxu0 %v3485_v57 }
 0x117   :  { %3516 = vmatpush3.bf16.msra.mxu1 %v3515_v37  ;;  %v2357_v55 = vpop.f32.mrb[2].mxu0  ;;  %v3545_v37 = vpack.c.bf16 %v610_v36, %v609_v35 }
 0x118   :  { %3518 = vmatprep.subr.bf16.mxu1 %v3517_v42  ;;  %v2358_v62 = vpop.f32.mrb[3].mxu0 }
 0x119   :  { %v2392_v0 = vpop.f32.mrb[2].mxu1  ;;  %v2359_v2 = vadd.f32 %v2358_v62, %v2357_v55  ;;  %3488 = vmatpush3.bf16.msra.mxu0 %v3487_v51 }
 0x11a   :  { %v2393_v3 = vpop.f32.mrb[3].mxu1  ;;  %3490 = vmatprep.subr.bf16.mxu0 %v3489_v54 }
 0x11b   :  { %v2394_v4 = vadd.f32 %v2393_v3, %v2392_v0  ;;  %3520 = vmatpush3.bf16.msra.mxu1 %v3519_v52  ;;  %v1011_v22 = vadd.f32 %v2359_v2, %v5275_v30  ;;  %v599_v30 = vld [vmem:[%s5569_s1 + $0x1200] sm:$0xff] }
 0x11c   :  { %3522 = vmatprep.subr.bf16.mxu1 %v3521_v56  ;;  %v3530_v18 = vpack.c.bf16 %v600_v16, %v599_v30 }
 0x11d   :  { %v1081_v12 = vadd.f32 %v2394_v4, %v1011_v22  ;;  %3492 = vmatpush3.bf16.msra.mxu0 %v3491_v11 }
 0x11e   :  { %3494 = vmatprep.subr.bf16.mxu0 %v3493_v7 }
 0x11f   :  { %3524 = vmatpush3.bf16.msra.mxu1 %v3523_v5 }
 0x120   :  { %3526 = vmatprep.subr.bf16.mxu1 %v3525_v9 }
 0x121   :  { %3496 = vmatpush3.bf16.msra.mxu0 %v3495_v13 }
 0x122   :  { %3529 = vmatprep.subr.bf16.mxu0 %v3589_v20 }
 0x123   :  { %3528 = vmatpush3.bf16.msra.mxu1 %v3527_v14 }
 0x124   :  { %3547 = vmatprep.subr.bf16.mxu1 %v3589_v20  ;;  %1989 = vmatmul.mubr.f32.vlgmr.msra.gmra.mrb[16].mxu0 %v748_v17 }
 0x125   :  { %3531 = vmatpush3.bf16.msra.mxu0 %v3530_v18  ;;  %2931 = vmatprep.mubr.msk.f32.mxu0 %vm3590_vm0, %v3591_v25 }
 0x126   :  { %2059 = vmatmul.mubr.f32.vlgmr.msra.gmra.mrb[16].mxu1 %v756_v19  ;;  %3532 = vmatprep.subr.bf16.mxu0 %v3589_v20 }
 0x127   :  { %2950 = vmatprep.mubr.msk.f32.mxu1 %vm3590_vm0, %v3591_v25 }
 0x129   :  { %3534 = vmatpush3.bf16.msra.mxu0 %v3533_v39 }
 0x12a   :  { %3535 = vmatprep.subr.bf16.mxu0 %v3589_v20 }
 0x12d   :  { %3537 = vmatpush3.bf16.msra.mxu0 %v3536_v26 }
 0x12e   :  { %3538 = vmatprep.subr.bf16.mxu0 %v3589_v20 }
 0x131   :  { %3540 = vmatpush3.bf16.msra.mxu0 %v3539_v32 }
 0x132   :  { %3541 = vmatprep.subr.bf16.mxu0 %v3589_v20 }
 0x135   :  { %3543 = vmatpush3.bf16.msra.mxu0 %v3542_v34 }
 0x136   :  { %3544 = vmatprep.subr.bf16.mxu0 %v3589_v20 }
 0x137   :  { %v2427_v57 = vpop.f32.mrb[4].mxu0 }
 0x138   :  { %v2428_v38 = vpop.f32.mrb[5].mxu0 }
 0x139   :  { %v2462_v40 = vpop.f32.mrb[4].mxu1  ;;  %v2429_v42 = vadd.f32 %v2428_v38, %v2427_v57  ;;  %3546 = vmatpush3.bf16.msra.mxu0 %v3545_v37 }
 0x13a   :  { %v2463_v44 = vpop.f32.mrb[5].mxu1 }
 0x13b   :  { %v2464_v47 = vadd.f32 %v2463_v44, %v2462_v40  ;;  %v1151_v48 = vadd.f32 %v2429_v42, %v1081_v12  ;;  %v2155_v42 = vld [vmem:[%s5571_s3 + $0x8] sm:$0xff] }
 0x13c   :  { %2932 = vmatmul.mubr.msk.f32.vlgmr.msra.gmra.mrb[18].mxu0 %vm801_vm1, %v764_v41  ;;  %v2154_v41 = vld [vmem:[%s5571_s3] sm:$0xff] }
 0x13d   :  { %v1221_v49 = vadd.f32 %v2464_v47, %v1151_v48  ;;  %v3548_v44 = vpack.c.bf16 %v2155_v42, %v2154_v41  ;;  %v2156_v47 = vld [vmem:[%s5571_s3 + $0x10] sm:$0xff]  ;;  %v2157_v48 = vld [vmem:[%s5571_s3 + $0x18] sm:$0xff] }
 0x13f   :  { %3549 = vmatpush3.bf16.msra.mxu1 %v3548_v44 }
 0x140   :  { %3550 = vmatprep.subr.bf16.mxu1 %v3589_v20 }
 0x157   :  { %v2497_v50 = vpop.f32.mrb[6].mxu0 }
 0x158   :  { %v2498_v51 = vpop.f32.mrb[7].mxu0 }
 0x159   :  { %v2532_v52 = vpop.f32.mrb[6].mxu1  ;;  %v2499_v54 = vadd.f32 %v2498_v51, %v2497_v50  ;;  %v2158_v50 = vld [vmem:[%s5571_s3 + $0x20] sm:$0xff]  ;;  %v2159_v51 = vld [vmem:[%s5571_s3 + $0x28] sm:$0xff] }
 0x15a   :  { %v2533_v15 = vpop.f32.mrb[7].mxu1 }
 0x15b   :  { %v2534_v31 = vadd.f32 %v2533_v15, %v2532_v52  ;;  %v1291_v63 = vadd.f32 %v2499_v54, %v1221_v49  ;;  %v3551_v49 = vpack.c.bf16 %v2157_v48, %v2156_v47  ;;  %v3554_v52 = vpack.c.bf16 %v2159_v51, %v2158_v50  ;;  %v2160_v54 = vld [vmem:[%s5571_s3 + $0x30] sm:$0xff]  ;;  %v2161_v15 = vld [vmem:[%s5571_s3 + $0x38] sm:$0xff] }
 0x15d   :  { %v1361_v55 = vadd.f32 %v2534_v31, %v1291_v63  ;;  %3552 = vmatpush3.bf16.msra.mxu1 %v3551_v49  ;;  %v3557_v31 = vpack.c.bf16 %v2161_v15, %v2160_v54 }
 0x15e   :  { %3553 = vmatprep.subr.bf16.mxu1 %v3589_v20 }
 0x161   :  { %3555 = vmatpush3.bf16.msra.mxu1 %v3554_v52 }
 0x162   :  { %3556 = vmatprep.subr.bf16.mxu1 %v3589_v20 }
 0x165   :  { %3558 = vmatpush3.bf16.msra.mxu1 %v3557_v31 }
 0x177   :  { %v2567_v56 = vpop.f32.mrb[8].mxu0 }
 0x178   :  { %v2568_v59 = vpop.f32.mrb[9].mxu0 }
 0x179   :  { %v2602_v60 = vpop.f32.mrb[8].mxu1  ;;  %v2569_v27 = vadd.f32 %v2568_v59, %v2567_v56 }
 0x17a   :  { %v2603_v46 = vpop.f32.mrb[9].mxu1 }
 0x17b   :  { %v2604_v61 = vadd.f32 %v2603_v46, %v2602_v60  ;;  %v1431_v62 = vadd.f32 %v2569_v27, %v1361_v55  ;;  %v2149_v60 = vld [vmem:[%s5570_s2 + $0x1] sm:$0x1]  ;;  %v2151_v27 = vld [vmem:[%s5570_s2 + $0x2] sm:$0x1] }
 0x17d   :  { %v1501_v0 = vadd.f32 %v2604_v61, %v1431_v62 }
 0x197   :  { %v2637_v1 = vpop.f32.mrb[10].mxu0 }
 0x198   :  { %v2638_v6 = vpop.f32.mrb[11].mxu0 }
 0x199   :  { %v2672_v2 = vpop.f32.mrb[10].mxu1  ;;  %v2639_v3 = vadd.f32 %v2638_v6, %v2637_v1 }
 0x19a   :  { %v2673_v11 = vpop.f32.mrb[11].mxu1 }
 0x19b   :  { %v2674_v4 = vadd.f32 %v2673_v11, %v2672_v2  ;;  %v1571_v5 = vadd.f32 %v2639_v3, %v1501_v0  ;;  %v2162_v0 = vld [vmem:[%s5570_s2 + $0x3] sm:$0x1] }
 0x19d   :  { %v1641_v7 = vadd.f32 %v2674_v4, %v1571_v5 }
 0x1b7   :  { %v2707_v8 = vpop.f32.mrb[12].mxu0 }
 0x1b8   :  { %v2708_v53 = vpop.f32.mrb[13].mxu0 }
 0x1b9   :  { %v2742_v22 = vpop.f32.mrb[12].mxu1  ;;  %v2709_v9 = vadd.f32 %v2708_v53, %v2707_v8 }
 0x1ba   :  { %v2743_v58 = vpop.f32.mrb[13].mxu1 }
 0x1bb   :  { %v2744_v10 = vadd.f32 %v2743_v58, %v2742_v22  ;;  %v1711_v12 = vadd.f32 %v2709_v9, %v1641_v7 }
 0x1bd   :  { %v1781_v13 = vadd.f32 %v2744_v10, %v1711_v12 }
 0x1d7   :  { %v2777_v14 = vpop.f32.mrb[14].mxu0 }
 0x1d8   :  { %v2778_v30 = vpop.f32.mrb[15].mxu0 }
 0x1d9   :  { %v2812_v16 = vpop.f32.mrb[14].mxu1  ;;  %v2779_v17 = vadd.f32 %v2778_v30, %v2777_v14 }
 0x1da   :  { %v2813_v18 = vpop.f32.mrb[15].mxu1 }
 0x1db   :  { %v2814_v19 = vadd.f32 %v2813_v18, %v2812_v16  ;;  %v1851_v21 = vadd.f32 %v2779_v17, %v1781_v13 }
 0x1dd   :  { %v1921_v23 = vadd.f32 %v2814_v19, %v1851_v21 }
 0x1f7   :  { %v2847_v39 = vpop.f32.mrb[16].mxu0 }
 0x1f8   :  { %v2848_v43 = vpop.f32.mrb[17].mxu0 }
 0x1f9   :  { %v2882_v24 = vpop.f32.mrb[16].mxu1  ;;  %v2849_v25 = vadd.f32 %v2848_v43, %v2847_v39 }
 0x1fa   :  { %v2883_v26 = vpop.f32.mrb[17].mxu1 }
 0x1fb   :  { %v2884_v28 = vadd.f32 %v2883_v26, %v2882_v24  ;;  %v1991_v29 = vadd.f32 %v2849_v25, %v1921_v23 }
 0x1fd   :  { %v2061_v32 = vadd.f32 %v2884_v28, %v1991_v29 }
 0x20f   :  { %v2130_v45 = vpop.f32.mrb[18].mxu0 }
 0x210   :  { %v2131_v33 = vadd.f32 %v2130_v45, %v2061_v32  ;;  %v2933_v34 = vpop.f32.mrb[19].mxu0 }
 0x212   :  { %v2135_v35 = vsel %vm2134_vm2, %v2131_v33, 0.0 }
 0x213   :  { %2136 = vadd.xlane.f32.xlu0 %v2135_v35 }
 0x2a0   :  { %v2137_v36 = vpop.xlane.xlu0 %2136 }
 0x2a1   :  { %v2139_v37 = vmul.f32 0.015625, %v2137_v36 }
 0x2a3   :  { %v2140_v57 = vsub.f32 %v2131_v33, %v2139_v37 }
 0x2a5   :  { %v2141_v38 = vmul.f32 %v2140_v57, %v2140_v57 }
 0x2a7   :  { %v2142_v40 = vsel %vm2134_vm2, %v2141_v38, 0.0 }
 0x2a8   :  { %2143 = vadd.xlane.f32.xlu0 %v2142_v40 }
 0x335   :  { %v2144_v63 = vpop.xlane.xlu0 %2143 }
 0x336   :  { %v2145_v55 = vmul.f32 0.015625, %v2144_v63 }
 0x338   :  { %v2146_v56 = vadd.f32 1e-05, %v2145_v55 }
 0x33a   :  { %3563 = vrsqrt.f32 %v2146_v56 }
 0x344   :  { %v3564_v59 = vpop.eup %3563 }
 0x345   :  { %v2148_v20 = vmul.f32 %v3564_v59, %v2140_v57 }
 0x347   :  { %v2150_v46 = vmul.f32 %v2149_v60, %v2148_v20 }
 0x349   :  { %v2152_v61 = vadd.f32 %v2151_v27, %v2150_v46 }
 0x34b   :  { %v2153_v62 = vmax.f32 %v2152_v61, 0.0 }
 0x34d   :  { %2951 = vmatmul.mubr.msk.f32.vlgmr.msra.gmra.mrb[18].mxu1 %vm2163_vm3, %v2153_v62 }
 0x420   :  { %v2233_v1 = vpop.f32.mrb[18].mxu1 }
 0x421   :  { %v2234_v6 = vadd.f32 %v2233_v1, %v2162_v0  ;;  %v2952_v2 = vpop.f32.mrb[19].mxu1 }
 0x423   :  { %2238 = vst.msk [vmem:[#allocation2] sm:$0x1] %vm2237_vm4, %v2234_v6 }
 0x424   :  { %3576 = shalt.err (!%p3573_p4)
}
 0x425   :  { %s3577_s2 = scalar_lea.hbm %s5572_s4, 16 }
 0x426   :  { %p3578_p5 = scmp.ne.s32.totalorder %s5572_s4, %s3577_s2  ;;  %p3581_p6 = scmp.lt.u32.totalorder %s3577_s2, %s5572_s4 }
 0x428   :  { %p3583_p7 = pnand %p3581_p6, %p3578_p5 }
 0x42a   :  { %3586 = shalt.err (!%p3583_p7)
}
 0x42b   :  { %2248 = dma.vmem_to_hbm [thread:$0]  %s2246_s22, 16, %s5572_s4, [#allocation3]  }
 0x42c   :  { %3587 = dma.done.wait [#allocation3], 16  }
 0x42d   :  { %3588 = vsyncadd [#allocation3], 4294967280 }
 0x42e   :  { %2252 = vsyncpa [#allocation3], 1 }

</bundles_post_ra>
